<compile_context>
chip_gen: v5e
topology: v5e:2x2
jax: 0.10.0
libtpu: 0.0.40
codegen_flags: <defaults>
</compile_context>

<pallas_src>
import functools

import jax
import jax.numpy as jnp
from jax.experimental import pallas as pl
from jax.experimental.pallas import tpu as pltpu


# ---------------------------------------------------------------------------
# Fused RDB kernel (one batch element per grid step)
# ---------------------------------------------------------------------------
def _rdb_fused_kernel(x_ref, w_ref, b_ref, wlff_ref, blff_ref, mask_ref,
                      o_ref, feat_ref, *, H, W, G0, G, C):
    """Fused RDB forward for one batch element (channels-first, flat spatial).

    Spatial layout: the zero-padded image grid (H+2, W+2) is flattened along
    the lane axis with row stride Wp = W+2.  For output pixel (y, x) and conv
    tap (ky, kx) the needed input sits at flat index ky*Wp+kx + (y*Wp+x), so
    each tap is ONE lane-dense matmul over a contiguous window of the scratch;
    the two "wrap" columns per row are junk and get masked to zero (they land
    exactly on the halo columns of the newly written channel).

      x_ref    (1, G0, (H+2)*(W+2))  zero-padded NCHW input, flattened   (f32)
      w_ref    (C, 9, G, Cin_max)    conv weights, tap-major, (G, Cin)   (bf16)
      b_ref    (C, G, 1)             conv biases                         (f32)
      wlff_ref (G0, Ctot)            LFF 1x1 weight                      (bf16)
      blff_ref (G0, 1)               LFF bias                            (f32)
      mask_ref (1, H*(W+2))          1.0 on real pixels, 0.0 on halo cols(f32)
      o_ref    (1, G0, H*(W+2))      output, row stride W+2 (host strips)(f32)
      feat_ref (Ctot, (H+3)*(W+2))   VMEM feature scratch                (f32)
    """
    Wp = W + 2
    P = (H + 2) * Wp               # padded image size
    P_pad = feat_ref.shape[1]      # (H+3)*Wp : one zero guard row for ky=2 taps
    HWp = H * Wp                   # matmul spatial extent (incl. junk cols)
    INT = Wp + 1                   # flat offset of interior pixel (0, 0)
    Ctot = G0 + C * G

    # --- zero the halo strips (every grid step; the interior is overwritten) ---
    feat_ref[:, 0:INT] = jnp.zeros((Ctot, INT), jnp.float32)
    feat_ref[:, (H + 1) * Wp:P_pad] = jnp.zeros(
        (Ctot, P_pad - (H + 1) * Wp), jnp.float32)

    # --- place the input (already zero-padded by the host): single read of x ---
    feat_ref[0:G0, 0:P] = x_ref[0]

    mask = mask_ref[...]           # (1, HWp) — hoisted out of the conv loop

    # --- dense conv chain: each step appends G channels (channels-first) ---
    for c in range(C):
        Cin = G0 + c * G
        w_step = w_ref[c]                                # (9, G, Cin_max) bf16
        acc = jnp.zeros((G, HWp), jnp.float32)
        for ky in range(3):
            for kx in range(3):
                s = ky * Wp + kx
                w_tap = w_step[ky * 3 + kx, :, 0:Cin]    # (G, Cin)    bf16
                win = feat_ref[0:Cin, s:s + HWp]         # (Cin, HWp)  f32
                acc = acc + jnp.dot(w_tap, win.astype(jnp.bfloat16),
                                    preferred_element_type=jnp.float32)
        out = jnp.maximum(acc + b_ref[c], 0.0) * mask    # bias + ReLU, halo -> 0
        feat_ref[Cin:Cin + G, INT:INT + HWp] = out       # aligned channel append

    # --- LFF 1x1 conv over the full stack + residual (lane-dense store) ---
    feat_int = feat_ref[:, INT:INT + HWp]                # (Ctot, HWp) f32
    resid = feat_int[0:G0, :]                            # exact f32 x (0 on halo)
    lff = jnp.dot(wlff_ref[...], feat_int.astype(jnp.bfloat16),
                  preferred_element_type=jnp.float32)    # (G0, HWp)
    o_ref[0] = (lff + blff_ref[...] + resid).astype(o_ref.dtype)


# ---------------------------------------------------------------------------
# RDB module: parameter init + forward
# ---------------------------------------------------------------------------
def init_rdb_params(key, G0, G, C):
    """Deterministic synthetic params (PyTorch layouts: OIHW conv weights)."""
    params = {"convs": [], "lff": None}
    for c in range(C):
        Cin = G0 + c * G
        key, kw, kb = jax.random.split(key, 3)
        scale = 1.0 / jnp.sqrt(9.0 * Cin)
        w = jax.random.normal(kw, (G, Cin, 3, 3), jnp.float32) * scale   # OIHW
        b = jax.random.normal(kb, (G,), jnp.float32) * scale
        params["convs"].append((w, b))
    Ctot = G0 + C * G
    key, kw, kb = jax.random.split(key, 3)
    scale = 1.0 / jnp.sqrt(float(Ctot))
    w_lff = jax.random.normal(kw, (G0, Ctot), jnp.float32) * scale       # (out,in)
    b_lff = jax.random.normal(kb, (G0,), jnp.float32) * scale
    params["lff"] = (w_lff, b_lff)
    return params


def rdb_forward_nchw(x_nchw, params):
    """Forward pass matching RDB.forward. Input/output are NCHW like PyTorch."""
    N, G0, H, W = x_nchw.shape
    C = len(params["convs"])
    G = params["convs"][0][0].shape[0]
    Ctot = G0 + C * G
    Cin_max = G0 + (C - 1) * G
    Wp = W + 2
    P = (H + 2) * Wp
    P_pad = (H + 3) * Wp
    HWp = H * Wp

    # Zero-pad the halo once on the host and flatten spatially: the kernel
    # reads x exactly once and also uses it for the exact-f32 residual.
    x_pad = jnp.pad(x_nchw.astype(jnp.float32), ((0, 0), (0, 0), (1, 1), (1, 1)))
    x_flat = x_pad.reshape(N, G0, P)

    # Pack conv weights tap-major and transposed to (G, Cin), zero-padded on Cin.
    w_all = jnp.zeros((C, 9, G, Cin_max), jnp.float32)
    b_all = jnp.zeros((C, G, 1), jnp.float32)
    for c, (w, b) in enumerate(params["convs"]):
        Cin = G0 + c * G
        wt = jnp.transpose(w, (2, 3, 0, 1)).reshape(9, G, Cin)   # (ky*3+kx, G, Cin)
        w_all = w_all.at[c, :, :, :Cin].set(wt)
        b_all = b_all.at[c, :, 0].set(b)
    w_all = w_all.astype(jnp.bfloat16)

    w_lff, b_lff = params["lff"]
    wlff = w_lff.astype(jnp.bfloat16)                    # (G0, Ctot)
    blff = b_lff.reshape(G0, 1).astype(jnp.float32)      # (G0, 1)

    # 1.0 on real pixels, 0.0 on the two wrap/halo columns per row.
    mask = (jnp.arange(HWp) % Wp < W).astype(jnp.float32).reshape(1, HWp)

    kernel = functools.partial(_rdb_fused_kernel, H=H, W=W, G0=G0, G=G, C=C)

    in_specs = [
        pl.BlockSpec((1, G0, P), lambda n: (n, 0, 0)),
        pl.BlockSpec(w_all.shape, lambda n: (0, 0, 0, 0)),
        pl.BlockSpec(b_all.shape, lambda n: (0, 0, 0)),
        pl.BlockSpec(wlff.shape, lambda n: (0, 0)),
        pl.BlockSpec(blff.shape, lambda n: (0, 0)),
        pl.BlockSpec(mask.shape, lambda n: (0, 0)),
    ]

    y = pl.pallas_call(
        kernel,
        out_shape=jax.ShapeDtypeStruct((N, G0, HWp), x_nchw.dtype),
        grid=(N,),
        in_specs=in_specs,
        out_specs=pl.BlockSpec((1, G0, HWp), lambda n: (n, 0, 0)),
        scratch_shapes=[pltpu.VMEM((Ctot, P_pad), jnp.float32)],
        compiler_params=pltpu.CompilerParams(
            dimension_semantics=("parallel",)),
    )(x_flat, w_all, b_all, wlff, blff, mask)

    # Strip the wrap columns (row stride W+2 -> W); result is already NCHW.
    return y.reshape(N, G0, H, Wp)[:, :, :, :W]


# ---------------------------------------------------------------------------
# Pure-JAX reference with matching mixed precision (bf16 matmul operands,
# f32 accumulation / bias / ReLU / residual) — for a sanity check only.
# ---------------------------------------------------------------------------
def rdb_reference_nchw(x_nchw, params):
    feat = x_nchw.astype(jnp.float32)
    for (w, b) in params["convs"]:
        dn = jax.lax.conv_dimension_numbers(feat.shape, w.shape,
                                            ("NCHW", "OIHW", "NCHW"))
        out = jax.lax.conv_general_dilated(
            feat.astype(jnp.bfloat16), w.astype(jnp.bfloat16), (1, 1), "SAME",
            dimension_numbers=dn, preferred_element_type=jnp.float32)
        out = jnp.maximum(out + b.reshape(1, -1, 1, 1), 0.0)
        feat = jnp.concatenate([feat, out], axis=1)
    w_lff, b_lff = params["lff"]
    y = jnp.einsum("nchw,dc->ndhw",
                   feat.astype(jnp.bfloat16), w_lff.astype(jnp.bfloat16),
                   preferred_element_type=jnp.float32)
    return y + b_lff.reshape(1, -1, 1, 1) + x_nchw


if __name__ == "__main__":
    G0, G, C = 8, 8, 3
    N, H, W = 2, 16, 16

    key = jax.random.PRNGKey(0)
    key, kx = jax.random.split(key)
    x = jax.random.normal(kx, (N, G0, H, W), jnp.float32)   # NCHW, as in PyTorch

    params = init_rdb_params(key, G0, G, C)

    y = jax.block_until_ready(rdb_forward_nchw(x, params))
    y_ref = jax.block_until_ready(rdb_reference_nchw(x, params))

    assert y.shape == (N, G0, H, W)
    max_err = float(jnp.max(jnp.abs(y - y_ref)))
    assert jnp.allclose(y, y_ref, atol=1e-2, rtol=1e-2), (
        f"mismatch vs reference: max abs err = {max_err}")

    print("KERNEL_OK")
</pallas_src>

<mosaic_0001>
module attributes {stable_mosaic.version = 11 : i64} {
  func.func @_rdb_fused_kernel(%arg0: i32, %arg1: memref<1x8x324xf32, #tpu.memory_space<vmem>>, %arg2: memref<3x9x8x24xbf16, #tpu.memory_space<vmem>>, %arg3: memref<3x8x1xf32, #tpu.memory_space<vmem>>, %arg4: memref<8x32xbf16, #tpu.memory_space<vmem>>, %arg5: memref<8x1xf32, #tpu.memory_space<vmem>>, %arg6: memref<1x288xf32, #tpu.memory_space<vmem>>, %arg7: memref<1x8x288xf32, #tpu.memory_space<vmem>>, %arg8: memref<32x342xf32, #tpu.memory_space<vmem>>) attributes {dimension_semantics = [#tpu.dimension_semantics<parallel>], iteration_bounds = array<i64: 2>, scalar_prefetch = 0 : i64, scratch_operands = 1 : i64, tpu.core_type = #tpu.core_type<tc>, window_params = [{transform_indices = @transform_0, window_bounds = array<i64: 1, 8, 324>}, {pipeline_mode = #tpu.pipeline_mode<synchronous>, transform_indices = @transform_1, window_bounds = array<i64: 3, 9, 8, 24>}, {pipeline_mode = #tpu.pipeline_mode<synchronous>, transform_indices = @transform_2, window_bounds = array<i64: 3, 8, 1>}, {pipeline_mode = #tpu.pipeline_mode<synchronous>, transform_indices = @transform_3, window_bounds = array<i64: 8, 32>}, {pipeline_mode = #tpu.pipeline_mode<synchronous>, transform_indices = @transform_4, window_bounds = array<i64: 8, 1>}, {pipeline_mode = #tpu.pipeline_mode<synchronous>, transform_indices = @transform_5, window_bounds = array<i64: 1, 288>}, {transform_indices = @transform_6, window_bounds = array<i64: 1, 8, 288>}]} {
    %cst = arith.constant 0.000000e+00 : f32
    %0 = vector.broadcast %cst : f32 to vector<32x19xf32>
    %c0 = arith.constant 0 : index
    %c0_0 = arith.constant 0 : index
    %1 = vector.load %arg8[%c0, %c0_0] : memref<32x342xf32, #tpu.memory_space<vmem>>, vector<32x19xf32>
    tpu.vector_store %arg8[%c0, %c0_0], %0 {strides = array<i32>} : memref<32x342xf32, #tpu.memory_space<vmem>>, vector<32x19xf32>,
    %cst_1 = arith.constant 0.000000e+00 : f32
    %2 = vector.broadcast %cst_1 : f32 to vector<32x36xf32>
    %c0_2 = arith.constant 0 : index
    %c306 = arith.constant 306 : index
    %3 = vector.load %arg8[%c0_2, %c306] : memref<32x342xf32, #tpu.memory_space<vmem>>, vector<32x36xf32>
    tpu.vector_store %arg8[%c0_2, %c306], %2 {strides = array<i32>} : memref<32x342xf32, #tpu.memory_space<vmem>>, vector<32x36xf32>,
    %c0_3 = arith.constant 0 : index
    %c0_4 = arith.constant 0 : index
    %c0_5 = arith.constant 0 : index
    %4 = vector.load %arg1[%c0_3, %c0_4, %c0_5] : memref<1x8x324xf32, #tpu.memory_space<vmem>>, vector<1x8x324xf32>
    %5 = vector.shape_cast %4 : vector<1x8x324xf32> to vector<8x324xf32>
    %c0_6 = arith.constant 0 : index
    %c0_7 = arith.constant 0 : index
    %6 = vector.load %arg8[%c0_6, %c0_7] : memref<32x342xf32, #tpu.memory_space<vmem>>, vector<8x324xf32>
    tpu.vector_store %arg8[%c0_6, %c0_7], %5 {strides = array<i32>} : memref<32x342xf32, #tpu.memory_space<vmem>>, vector<8x324xf32>,
    %c0_8 = arith.constant 0 : index
    %c0_9 = arith.constant 0 : index
    %7 = vector.load %arg6[%c0_8, %c0_9] : memref<1x288xf32, #tpu.memory_space<vmem>>, vector<1x288xf32>
    %c0_10 = arith.constant 0 : index
    %c0_11 = arith.constant 0 : index
    %c0_12 = arith.constant 0 : index
    %c0_13 = arith.constant 0 : index
    %8 = vector.load %arg2[%c0_10, %c0_11, %c0_12, %c0_13] : memref<3x9x8x24xbf16, #tpu.memory_space<vmem>>, vector<1x9x8x24xbf16>
    %9 = vector.shape_cast %8 : vector<1x9x8x24xbf16> to vector<9x8x24xbf16>
    %cst_14 = arith.constant 0.000000e+00 : f32
    %10 = vector.broadcast %cst_14 : f32 to vector<8x288xf32>
    %11 = vector.extract_strided_slice %9 {offsets = [0, 0, 0], sizes = [1, 8, 8], strides = [1, 1, 1]} : vector<9x8x24xbf16> to vector<1x8x8xbf16>
    %12 = vector.shape_cast %11 : vector<1x8x8xbf16> to vector<8x8xbf16>
    %c0_15 = arith.constant 0 : index
    %c0_16 = arith.constant 0 : index
    %13 = vector.load %arg8[%c0_15, %c0_16] : memref<32x342xf32, #tpu.memory_space<vmem>>, vector<8x288xf32>
    %14 = arith.truncf %13 : vector<8x288xf32> to vector<8x288xbf16>
    %cst_17 = arith.constant dense<0.000000e+00> : vector<8x288xf32>
    %15 = tpu.matmul %12, %14, %cst_17 {dimension_numbers = #tpu.dot_dimension_numbers<[1], [0], [0], [1], [0, 0, 1, 1], [], []>} : vector<8x8xbf16>, vector<8x288xbf16>, vector<8x288xf32> -> vector<8x288xf32>
    %16 = arith.addf %10, %15 : vector<8x288xf32>
    %17 = vector.extract_strided_slice %9 {offsets = [1, 0, 0], sizes = [1, 8, 8], strides = [1, 1, 1]} : vector<9x8x24xbf16> to vector<1x8x8xbf16>
    %18 = vector.shape_cast %17 : vector<1x8x8xbf16> to vector<8x8xbf16>
    %c0_18 = arith.constant 0 : index
    %c1 = arith.constant 1 : index
    %19 = vector.load %arg8[%c0_18, %c1] : memref<32x342xf32, #tpu.memory_space<vmem>>, vector<8x288xf32>
    %20 = arith.truncf %19 : vector<8x288xf32> to vector<8x288xbf16>
    %cst_19 = arith.constant dense<0.000000e+00> : vector<8x288xf32>
    %21 = tpu.matmul %18, %20, %cst_19 {dimension_numbers = #tpu.dot_dimension_numbers<[1], [0], [0], [1], [0, 0, 1, 1], [], []>} : vector<8x8xbf16>, vector<8x288xbf16>, vector<8x288xf32> -> vector<8x288xf32>
    %22 = arith.addf %16, %21 : vector<8x288xf32>
    %23 = vector.extract_strided_slice %9 {offsets = [2, 0, 0], sizes = [1, 8, 8], strides = [1, 1, 1]} : vector<9x8x24xbf16> to vector<1x8x8xbf16>
    %24 = vector.shape_cast %23 : vector<1x8x8xbf16> to vector<8x8xbf16>
    %c0_20 = arith.constant 0 : index
    %c2 = arith.constant 2 : index
    %25 = vector.load %arg8[%c0_20, %c2] : memref<32x342xf32, #tpu.memory_space<vmem>>, vector<8x288xf32>
    %26 = arith.truncf %25 : vector<8x288xf32> to vector<8x288xbf16>
    %cst_21 = arith.constant dense<0.000000e+00> : vector<8x288xf32>
    %27 = tpu.matmul %24, %26, %cst_21 {dimension_numbers = #tpu.dot_dimension_numbers<[1], [0], [0], [1], [0, 0, 1, 1], [], []>} : vector<8x8xbf16>, vector<8x288xbf16>, vector<8x288xf32> -> vector<8x288xf32>
    %28 = arith.addf %22, %27 : vector<8x288xf32>
    %29 = vector.extract_strided_slice %9 {offsets = [3, 0, 0], sizes = [1, 8, 8], strides = [1, 1, 1]} : vector<9x8x24xbf16> to vector<1x8x8xbf16>
    %30 = vector.shape_cast %29 : vector<1x8x8xbf16> to vector<8x8xbf16>
    %c0_22 = arith.constant 0 : index
    %c18 = arith.constant 18 : index
    %31 = vector.load %arg8[%c0_22, %c18] : memref<32x342xf32, #tpu.memory_space<vmem>>, vector<8x288xf32>
    %32 = arith.truncf %31 : vector<8x288xf32> to vector<8x288xbf16>
    %cst_23 = arith.constant dense<0.000000e+00> : vector<8x288xf32>
    %33 = tpu.matmul %30, %32, %cst_23 {dimension_numbers = #tpu.dot_dimension_numbers<[1], [0], [0], [1], [0, 0, 1, 1], [], []>} : vector<8x8xbf16>, vector<8x288xbf16>, vector<8x288xf32> -> vector<8x288xf32>
    %34 = arith.addf %28, %33 : vector<8x288xf32>
    %35 = vector.extract_strided_slice %9 {offsets = [4, 0, 0], sizes = [1, 8, 8], strides = [1, 1, 1]} : vector<9x8x24xbf16> to vector<1x8x8xbf16>
    %36 = vector.shape_cast %35 : vector<1x8x8xbf16> to vector<8x8xbf16>
    %c0_24 = arith.constant 0 : index
    %c19 = arith.constant 19 : index
    %37 = vector.load %arg8[%c0_24, %c19] : memref<32x342xf32, #tpu.memory_space<vmem>>, vector<8x288xf32>
    %38 = arith.truncf %37 : vector<8x288xf32> to vector<8x288xbf16>
    %cst_25 = arith.constant dense<0.000000e+00> : vector<8x288xf32>
    %39 = tpu.matmul %36, %38, %cst_25 {dimension_numbers = #tpu.dot_dimension_numbers<[1], [0], [0], [1], [0, 0, 1, 1], [], []>} : vector<8x8xbf16>, vector<8x288xbf16>, vector<8x288xf32> -> vector<8x288xf32>
    %40 = arith.addf %34, %39 : vector<8x288xf32>
    %41 = vector.extract_strided_slice %9 {offsets = [5, 0, 0], sizes = [1, 8, 8], strides = [1, 1, 1]} : vector<9x8x24xbf16> to vector<1x8x8xbf16>
    %42 = vector.shape_cast %41 : vector<1x8x8xbf16> to vector<8x8xbf16>
    %c0_26 = arith.constant 0 : index
    %c20 = arith.constant 20 : index
    %43 = vector.load %arg8[%c0_26, %c20] : memref<32x342xf32, #tpu.memory_space<vmem>>, vector<8x288xf32>
    %44 = arith.truncf %43 : vector<8x288xf32> to vector<8x288xbf16>
    %cst_27 = arith.constant dense<0.000000e+00> : vector<8x288xf32>
    %45 = tpu.matmul %42, %44, %cst_27 {dimension_numbers = #tpu.dot_dimension_numbers<[1], [0], [0], [1], [0, 0, 1, 1], [], []>} : vector<8x8xbf16>, vector<8x288xbf16>, vector<8x288xf32> -> vector<8x288xf32>
    %46 = arith.addf %40, %45 : vector<8x288xf32>
    %47 = vector.extract_strided_slice %9 {offsets = [6, 0, 0], sizes = [1, 8, 8], strides = [1, 1, 1]} : vector<9x8x24xbf16> to vector<1x8x8xbf16>
    %48 = vector.shape_cast %47 : vector<1x8x8xbf16> to vector<8x8xbf16>
    %c0_28 = arith.constant 0 : index
    %c36 = arith.constant 36 : index
    %49 = vector.load %arg8[%c0_28, %c36] : memref<32x342xf32, #tpu.memory_space<vmem>>, vector<8x288xf32>
    %50 = arith.truncf %49 : vector<8x288xf32> to vector<8x288xbf16>
    %cst_29 = arith.constant dense<0.000000e+00> : vector<8x288xf32>
    %51 = tpu.matmul %48, %50, %cst_29 {dimension_numbers = #tpu.dot_dimension_numbers<[1], [0], [0], [1], [0, 0, 1, 1], [], []>} : vector<8x8xbf16>, vector<8x288xbf16>, vector<8x288xf32> -> vector<8x288xf32>
    %52 = arith.addf %46, %51 : vector<8x288xf32>
    %53 = vector.extract_strided_slice %9 {offsets = [7, 0, 0], sizes = [1, 8, 8], strides = [1, 1, 1]} : vector<9x8x24xbf16> to vector<1x8x8xbf16>
    %54 = vector.shape_cast %53 : vector<1x8x8xbf16> to vector<8x8xbf16>
    %c0_30 = arith.constant 0 : index
    %c37 = arith.constant 37 : index
    %55 = vector.load %arg8[%c0_30, %c37] : memref<32x342xf32, #tpu.memory_space<vmem>>, vector<8x288xf32>
    %56 = arith.truncf %55 : vector<8x288xf32> to vector<8x288xbf16>
    %cst_31 = arith.constant dense<0.000000e+00> : vector<8x288xf32>
    %57 = tpu.matmul %54, %56, %cst_31 {dimension_numbers = #tpu.dot_dimension_numbers<[1], [0], [0], [1], [0, 0, 1, 1], [], []>} : vector<8x8xbf16>, vector<8x288xbf16>, vector<8x288xf32> -> vector<8x288xf32>
    %58 = arith.addf %52, %57 : vector<8x288xf32>
    %59 = vector.extract_strided_slice %9 {offsets = [8, 0, 0], sizes = [1, 8, 8], strides = [1, 1, 1]} : vector<9x8x24xbf16> to vector<1x8x8xbf16>
    %60 = vector.shape_cast %59 : vector<1x8x8xbf16> to vector<8x8xbf16>
    %c0_32 = arith.constant 0 : index
    %c38 = arith.constant 38 : index
    %61 = vector.load %arg8[%c0_32, %c38] : memref<32x342xf32, #tpu.memory_space<vmem>>, vector<8x288xf32>
    %62 = arith.truncf %61 : vector<8x288xf32> to vector<8x288xbf16>
    %cst_33 = arith.constant dense<0.000000e+00> : vector<8x288xf32>
    %63 = tpu.matmul %60, %62, %cst_33 {dimension_numbers = #tpu.dot_dimension_numbers<[1], [0], [0], [1], [0, 0, 1, 1], [], []>} : vector<8x8xbf16>, vector<8x288xbf16>, vector<8x288xf32> -> vector<8x288xf32>
    %64 = arith.addf %58, %63 : vector<8x288xf32>
    %c0_34 = arith.constant 0 : index
    %c0_35 = arith.constant 0 : index
    %c0_36 = arith.constant 0 : index
    %65 = vector.load %arg3[%c0_34, %c0_35, %c0_36] : memref<3x8x1xf32, #tpu.memory_space<vmem>>, vector<1x8x1xf32>
    %66 = vector.shape_cast %65 : vector<1x8x1xf32> to vector<8x1xf32>
    %67 = vector.broadcast %66 : vector<8x1xf32> to vector<8x288xf32>
    %68 = arith.addf %64, %67 : vector<8x288xf32>
    %cst_37 = arith.constant 0.000000e+00 : f32
    %69 = vector.broadcast %cst_37 : f32 to vector<8x288xf32>
    %70 = arith.maximumf %68, %69 : vector<8x288xf32>
    %71 = vector.broadcast %7 : vector<1x288xf32> to vector<8x288xf32>
    %72 = arith.mulf %70, %71 : vector<8x288xf32>
    %c8 = arith.constant 8 : index
    %c19_38 = arith.constant 19 : index
    %73 = vector.load %arg8[%c8, %c19_38] : memref<32x342xf32, #tpu.memory_space<vmem>>, vector<8x288xf32>
    tpu.vector_store %arg8[%c8, %c19_38], %72 {strides = array<i32>} : memref<32x342xf32, #tpu.memory_space<vmem>>, vector<8x288xf32>,
    %c1_39 = arith.constant 1 : index
    %c0_40 = arith.constant 0 : index
    %c0_41 = arith.constant 0 : index
    %c0_42 = arith.constant 0 : index
    %74 = vector.load %arg2[%c1_39, %c0_40, %c0_41, %c0_42] : memref<3x9x8x24xbf16, #tpu.memory_space<vmem>>, vector<1x9x8x24xbf16>
    %75 = vector.shape_cast %74 : vector<1x9x8x24xbf16> to vector<9x8x24xbf16>
    %cst_43 = arith.constant 0.000000e+00 : f32
    %76 = vector.broadcast %cst_43 : f32 to vector<8x288xf32>
    %77 = vector.extract_strided_slice %75 {offsets = [0, 0, 0], sizes = [1, 8, 16], strides = [1, 1, 1]} : vector<9x8x24xbf16> to vector<1x8x16xbf16>
    %78 = vector.shape_cast %77 : vector<1x8x16xbf16> to vector<8x16xbf16>
    %c0_44 = arith.constant 0 : index
    %c0_45 = arith.constant 0 : index
    %79 = vector.load %arg8[%c0_44, %c0_45] : memref<32x342xf32, #tpu.memory_space<vmem>>, vector<16x288xf32>
    %80 = arith.truncf %79 : vector<16x288xf32> to vector<16x288xbf16>
    %cst_46 = arith.constant dense<0.000000e+00> : vector<8x288xf32>
    %81 = tpu.matmul %78, %80, %cst_46 {dimension_numbers = #tpu.dot_dimension_numbers<[1], [0], [0], [1], [0, 0, 1, 1], [], []>} : vector<8x16xbf16>, vector<16x288xbf16>, vector<8x288xf32> -> vector<8x288xf32>
    %82 = arith.addf %76, %81 : vector<8x288xf32>
    %83 = vector.extract_strided_slice %75 {offsets = [1, 0, 0], sizes = [1, 8, 16], strides = [1, 1, 1]} : vector<9x8x24xbf16> to vector<1x8x16xbf16>
    %84 = vector.shape_cast %83 : vector<1x8x16xbf16> to vector<8x16xbf16>
    %c0_47 = arith.constant 0 : index
    %c1_48 = arith.constant 1 : index
    %85 = vector.load %arg8[%c0_47, %c1_48] : memref<32x342xf32, #tpu.memory_space<vmem>>, vector<16x288xf32>
    %86 = arith.truncf %85 : vector<16x288xf32> to vector<16x288xbf16>
    %cst_49 = arith.constant dense<0.000000e+00> : vector<8x288xf32>
    %87 = tpu.matmul %84, %86, %cst_49 {dimension_numbers = #tpu.dot_dimension_numbers<[1], [0], [0], [1], [0, 0, 1, 1], [], []>} : vector<8x16xbf16>, vector<16x288xbf16>, vector<8x288xf32> -> vector<8x288xf32>
    %88 = arith.addf %82, %87 : vector<8x288xf32>
    %89 = vector.extract_strided_slice %75 {offsets = [2, 0, 0], sizes = [1, 8, 16], strides = [1, 1, 1]} : vector<9x8x24xbf16> to vector<1x8x16xbf16>
    %90 = vector.shape_cast %89 : vector<1x8x16xbf16> to vector<8x16xbf16>
    %c0_50 = arith.constant 0 : index
    %c2_51 = arith.constant 2 : index
    %91 = vector.load %arg8[%c0_50, %c2_51] : memref<32x342xf32, #tpu.memory_space<vmem>>, vector<16x288xf32>
    %92 = arith.truncf %91 : vector<16x288xf32> to vector<16x288xbf16>
    %cst_52 = arith.constant dense<0.000000e+00> : vector<8x288xf32>
    %93 = tpu.matmul %90, %92, %cst_52 {dimension_numbers = #tpu.dot_dimension_numbers<[1], [0], [0], [1], [0, 0, 1, 1], [], []>} : vector<8x16xbf16>, vector<16x288xbf16>, vector<8x288xf32> -> vector<8x288xf32>
    %94 = arith.addf %88, %93 : vector<8x288xf32>
    %95 = vector.extract_strided_slice %75 {offsets = [3, 0, 0], sizes = [1, 8, 16], strides = [1, 1, 1]} : vector<9x8x24xbf16> to vector<1x8x16xbf16>
    %96 = vector.shape_cast %95 : vector<1x8x16xbf16> to vector<8x16xbf16>
    %c0_53 = arith.constant 0 : index
    %c18_54 = arith.constant 18 : index
    %97 = vector.load %arg8[%c0_53, %c18_54] : memref<32x342xf32, #tpu.memory_space<vmem>>, vector<16x288xf32>
    %98 = arith.truncf %97 : vector<16x288xf32> to vector<16x288xbf16>
    %cst_55 = arith.constant dense<0.000000e+00> : vector<8x288xf32>
    %99 = tpu.matmul %96, %98, %cst_55 {dimension_numbers = #tpu.dot_dimension_numbers<[1], [0], [0], [1], [0, 0, 1, 1], [], []>} : vector<8x16xbf16>, vector<16x288xbf16>, vector<8x288xf32> -> vector<8x288xf32>
    %100 = arith.addf %94, %99 : vector<8x288xf32>
    %101 = vector.extract_strided_slice %75 {offsets = [4, 0, 0], sizes = [1, 8, 16], strides = [1, 1, 1]} : vector<9x8x24xbf16> to vector<1x8x16xbf16>
    %102 = vector.shape_cast %101 : vector<1x8x16xbf16> to vector<8x16xbf16>
    %c0_56 = arith.constant 0 : index
    %c19_57 = arith.constant 19 : index
    %103 = vector.load %arg8[%c0_56, %c19_57] : memref<32x342xf32, #tpu.memory_space<vmem>>, vector<16x288xf32>
    %104 = arith.truncf %103 : vector<16x288xf32> to vector<16x288xbf16>
    %cst_58 = arith.constant dense<0.000000e+00> : vector<8x288xf32>
    %105 = tpu.matmul %102, %104, %cst_58 {dimension_numbers = #tpu.dot_dimension_numbers<[1], [0], [0], [1], [0, 0, 1, 1], [], []>} : vector<8x16xbf16>, vector<16x288xbf16>, vector<8x288xf32> -> vector<8x288xf32>
    %106 = arith.addf %100, %105 : vector<8x288xf32>
    %107 = vector.extract_strided_slice %75 {offsets = [5, 0, 0], sizes = [1, 8, 16], strides = [1, 1, 1]} : vector<9x8x24xbf16> to vector<1x8x16xbf16>
    %108 = vector.shape_cast %107 : vector<1x8x16xbf16> to vector<8x16xbf16>
    %c0_59 = arith.constant 0 : index
    %c20_60 = arith.constant 20 : index
    %109 = vector.load %arg8[%c0_59, %c20_60] : memref<32x342xf32, #tpu.memory_space<vmem>>, vector<16x288xf32>
    %110 = arith.truncf %109 : vector<16x288xf32> to vector<16x288xbf16>
    %cst_61 = arith.constant dense<0.000000e+00> : vector<8x288xf32>
    %111 = tpu.matmul %108, %110, %cst_61 {dimension_numbers = #tpu.dot_dimension_numbers<[1], [0], [0], [1], [0, 0, 1, 1], [], []>} : vector<8x16xbf16>, vector<16x288xbf16>, vector<8x288xf32> -> vector<8x288xf32>
    %112 = arith.addf %106, %111 : vector<8x288xf32>
    %113 = vector.extract_strided_slice %75 {offsets = [6, 0, 0], sizes = [1, 8, 16], strides = [1, 1, 1]} : vector<9x8x24xbf16> to vector<1x8x16xbf16>
    %114 = vector.shape_cast %113 : vector<1x8x16xbf16> to vector<8x16xbf16>
    %c0_62 = arith.constant 0 : index
    %c36_63 = arith.constant 36 : index
    %115 = vector.load %arg8[%c0_62, %c36_63] : memref<32x342xf32, #tpu.memory_space<vmem>>, vector<16x288xf32>
    %116 = arith.truncf %115 : vector<16x288xf32> to vector<16x288xbf16>
    %cst_64 = arith.constant dense<0.000000e+00> : vector<8x288xf32>
    %117 = tpu.matmul %114, %116, %cst_64 {dimension_numbers = #tpu.dot_dimension_numbers<[1], [0], [0], [1], [0, 0, 1, 1], [], []>} : vector<8x16xbf16>, vector<16x288xbf16>, vector<8x288xf32> -> vector<8x288xf32>
    %118 = arith.addf %112, %117 : vector<8x288xf32>
    %119 = vector.extract_strided_slice %75 {offsets = [7, 0, 0], sizes = [1, 8, 16], strides = [1, 1, 1]} : vector<9x8x24xbf16> to vector<1x8x16xbf16>
    %120 = vector.shape_cast %119 : vector<1x8x16xbf16> to vector<8x16xbf16>
    %c0_65 = arith.constant 0 : index
    %c37_66 = arith.constant 37 : index
    %121 = vector.load %arg8[%c0_65, %c37_66] : memref<32x342xf32, #tpu.memory_space<vmem>>, vector<16x288xf32>
    %122 = arith.truncf %121 : vector<16x288xf32> to vector<16x288xbf16>
    %cst_67 = arith.constant dense<0.000000e+00> : vector<8x288xf32>
    %123 = tpu.matmul %120, %122, %cst_67 {dimension_numbers = #tpu.dot_dimension_numbers<[1], [0], [0], [1], [0, 0, 1, 1], [], []>} : vector<8x16xbf16>, vector<16x288xbf16>, vector<8x288xf32> -> vector<8x288xf32>
    %124 = arith.addf %118, %123 : vector<8x288xf32>
    %125 = vector.extract_strided_slice %75 {offsets = [8, 0, 0], sizes = [1, 8, 16], strides = [1, 1, 1]} : vector<9x8x24xbf16> to vector<1x8x16xbf16>
    %126 = vector.shape_cast %125 : vector<1x8x16xbf16> to vector<8x16xbf16>
    %c0_68 = arith.constant 0 : index
    %c38_69 = arith.constant 38 : index
    %127 = vector.load %arg8[%c0_68, %c38_69] : memref<32x342xf32, #tpu.memory_space<vmem>>, vector<16x288xf32>
    %128 = arith.truncf %127 : vector<16x288xf32> to vector<16x288xbf16>
    %cst_70 = arith.constant dense<0.000000e+00> : vector<8x288xf32>
    %129 = tpu.matmul %126, %128, %cst_70 {dimension_numbers = #tpu.dot_dimension_numbers<[1], [0], [0], [1], [0, 0, 1, 1], [], []>} : vector<8x16xbf16>, vector<16x288xbf16>, vector<8x288xf32> -> vector<8x288xf32>
    %130 = arith.addf %124, %129 : vector<8x288xf32>
    %c1_71 = arith.constant 1 : index
    %c0_72 = arith.constant 0 : index
    %c0_73 = arith.constant 0 : index
    %131 = vector.load %arg3[%c1_71, %c0_72, %c0_73] : memref<3x8x1xf32, #tpu.memory_space<vmem>>, vector<1x8x1xf32>
    %132 = vector.shape_cast %131 : vector<1x8x1xf32> to vector<8x1xf32>
    %133 = vector.broadcast %132 : vector<8x1xf32> to vector<8x288xf32>
    %134 = arith.addf %130, %133 : vector<8x288xf32>
    %cst_74 = arith.constant 0.000000e+00 : f32
    %135 = vector.broadcast %cst_74 : f32 to vector<8x288xf32>
    %136 = arith.maximumf %134, %135 : vector<8x288xf32>
    %137 = vector.broadcast %7 : vector<1x288xf32> to vector<8x288xf32>
    %138 = arith.mulf %136, %137 : vector<8x288xf32>
    %c16 = arith.constant 16 : index
    %c19_75 = arith.constant 19 : index
    %139 = vector.load %arg8[%c16, %c19_75] : memref<32x342xf32, #tpu.memory_space<vmem>>, vector<8x288xf32>
    tpu.vector_store %arg8[%c16, %c19_75], %138 {strides = array<i32>} : memref<32x342xf32, #tpu.memory_space<vmem>>, vector<8x288xf32>,
    %c2_76 = arith.constant 2 : index
    %c0_77 = arith.constant 0 : index
    %c0_78 = arith.constant 0 : index
    %c0_79 = arith.constant 0 : index
    %140 = vector.load %arg2[%c2_76, %c0_77, %c0_78, %c0_79] : memref<3x9x8x24xbf16, #tpu.memory_space<vmem>>, vector<1x9x8x24xbf16>
    %141 = vector.shape_cast %140 : vector<1x9x8x24xbf16> to vector<9x8x24xbf16>
    %cst_80 = arith.constant 0.000000e+00 : f32
    %142 = vector.broadcast %cst_80 : f32 to vector<8x288xf32>
    %143 = vector.extract_strided_slice %141 {offsets = [0, 0, 0], sizes = [1, 8, 24], strides = [1, 1, 1]} : vector<9x8x24xbf16> to vector<1x8x24xbf16>
    %144 = vector.shape_cast %143 : vector<1x8x24xbf16> to vector<8x24xbf16>
    %c0_81 = arith.constant 0 : index
    %c0_82 = arith.constant 0 : index
    %145 = vector.load %arg8[%c0_81, %c0_82] : memref<32x342xf32, #tpu.memory_space<vmem>>, vector<24x288xf32>
    %146 = arith.truncf %145 : vector<24x288xf32> to vector<24x288xbf16>
    %cst_83 = arith.constant dense<0.000000e+00> : vector<8x288xf32>
    %147 = tpu.matmul %144, %146, %cst_83 {dimension_numbers = #tpu.dot_dimension_numbers<[1], [0], [0], [1], [0, 0, 1, 1], [], []>} : vector<8x24xbf16>, vector<24x288xbf16>, vector<8x288xf32> -> vector<8x288xf32>
    %148 = arith.addf %142, %147 : vector<8x288xf32>
    %149 = vector.extract_strided_slice %141 {offsets = [1, 0, 0], sizes = [1, 8, 24], strides = [1, 1, 1]} : vector<9x8x24xbf16> to vector<1x8x24xbf16>
    %150 = vector.shape_cast %149 : vector<1x8x24xbf16> to vector<8x24xbf16>
    %c0_84 = arith.constant 0 : index
    %c1_85 = arith.constant 1 : index
    %151 = vector.load %arg8[%c0_84, %c1_85] : memref<32x342xf32, #tpu.memory_space<vmem>>, vector<24x288xf32>
    %152 = arith.truncf %151 : vector<24x288xf32> to vector<24x288xbf16>
    %cst_86 = arith.constant dense<0.000000e+00> : vector<8x288xf32>
    %153 = tpu.matmul %150, %152, %cst_86 {dimension_numbers = #tpu.dot_dimension_numbers<[1], [0], [0], [1], [0, 0, 1, 1], [], []>} : vector<8x24xbf16>, vector<24x288xbf16>, vector<8x288xf32> -> vector<8x288xf32>
    %154 = arith.addf %148, %153 : vector<8x288xf32>
    %155 = vector.extract_strided_slice %141 {offsets = [2, 0, 0], sizes = [1, 8, 24], strides = [1, 1, 1]} : vector<9x8x24xbf16> to vector<1x8x24xbf16>
    %156 = vector.shape_cast %155 : vector<1x8x24xbf16> to vector<8x24xbf16>
    %c0_87 = arith.constant 0 : index
    %c2_88 = arith.constant 2 : index
    %157 = vector.load %arg8[%c0_87, %c2_88] : memref<32x342xf32, #tpu.memory_space<vmem>>, vector<24x288xf32>
    %158 = arith.truncf %157 : vector<24x288xf32> to vector<24x288xbf16>
    %cst_89 = arith.constant dense<0.000000e+00> : vector<8x288xf32>
    %159 = tpu.matmul %156, %158, %cst_89 {dimension_numbers = #tpu.dot_dimension_numbers<[1], [0], [0], [1], [0, 0, 1, 1], [], []>} : vector<8x24xbf16>, vector<24x288xbf16>, vector<8x288xf32> -> vector<8x288xf32>
    %160 = arith.addf %154, %159 : vector<8x288xf32>
    %161 = vector.extract_strided_slice %141 {offsets = [3, 0, 0], sizes = [1, 8, 24], strides = [1, 1, 1]} : vector<9x8x24xbf16> to vector<1x8x24xbf16>
    %162 = vector.shape_cast %161 : vector<1x8x24xbf16> to vector<8x24xbf16>
    %c0_90 = arith.constant 0 : index
    %c18_91 = arith.constant 18 : index
    %163 = vector.load %arg8[%c0_90, %c18_91] : memref<32x342xf32, #tpu.memory_space<vmem>>, vector<24x288xf32>
    %164 = arith.truncf %163 : vector<24x288xf32> to vector<24x288xbf16>
    %cst_92 = arith.constant dense<0.000000e+00> : vector<8x288xf32>
    %165 = tpu.matmul %162, %164, %cst_92 {dimension_numbers = #tpu.dot_dimension_numbers<[1], [0], [0], [1], [0, 0, 1, 1], [], []>} : vector<8x24xbf16>, vector<24x288xbf16>, vector<8x288xf32> -> vector<8x288xf32>
    %166 = arith.addf %160, %165 : vector<8x288xf32>
    %167 = vector.extract_strided_slice %141 {offsets = [4, 0, 0], sizes = [1, 8, 24], strides = [1, 1, 1]} : vector<9x8x24xbf16> to vector<1x8x24xbf16>
    %168 = vector.shape_cast %167 : vector<1x8x24xbf16> to vector<8x24xbf16>
    %c0_93 = arith.constant 0 : index
    %c19_94 = arith.constant 19 : index
    %169 = vector.load %arg8[%c0_93, %c19_94] : memref<32x342xf32, #tpu.memory_space<vmem>>, vector<24x288xf32>
    %170 = arith.truncf %169 : vector<24x288xf32> to vector<24x288xbf16>
    %cst_95 = arith.constant dense<0.000000e+00> : vector<8x288xf32>
    %171 = tpu.matmul %168, %170, %cst_95 {dimension_numbers = #tpu.dot_dimension_numbers<[1], [0], [0], [1], [0, 0, 1, 1], [], []>} : vector<8x24xbf16>, vector<24x288xbf16>, vector<8x288xf32> -> vector<8x288xf32>
    %172 = arith.addf %166, %171 : vector<8x288xf32>
    %173 = vector.extract_strided_slice %141 {offsets = [5, 0, 0], sizes = [1, 8, 24], strides = [1, 1, 1]} : vector<9x8x24xbf16> to vector<1x8x24xbf16>
    %174 = vector.shape_cast %173 : vector<1x8x24xbf16> to vector<8x24xbf16>
    %c0_96 = arith.constant 0 : index
    %c20_97 = arith.constant 20 : index
    %175 = vector.load %arg8[%c0_96, %c20_97] : memref<32x342xf32, #tpu.memory_space<vmem>>, vector<24x288xf32>
    %176 = arith.truncf %175 : vector<24x288xf32> to vector<24x288xbf16>
    %cst_98 = arith.constant dense<0.000000e+00> : vector<8x288xf32>
    %177 = tpu.matmul %174, %176, %cst_98 {dimension_numbers = #tpu.dot_dimension_numbers<[1], [0], [0], [1], [0, 0, 1, 1], [], []>} : vector<8x24xbf16>, vector<24x288xbf16>, vector<8x288xf32> -> vector<8x288xf32>
    %178 = arith.addf %172, %177 : vector<8x288xf32>
    %179 = vector.extract_strided_slice %141 {offsets = [6, 0, 0], sizes = [1, 8, 24], strides = [1, 1, 1]} : vector<9x8x24xbf16> to vector<1x8x24xbf16>
    %180 = vector.shape_cast %179 : vector<1x8x24xbf16> to vector<8x24xbf16>
    %c0_99 = arith.constant 0 : index
    %c36_100 = arith.constant 36 : index
    %181 = vector.load %arg8[%c0_99, %c36_100] : memref<32x342xf32, #tpu.memory_space<vmem>>, vector<24x288xf32>
    %182 = arith.truncf %181 : vector<24x288xf32> to vector<24x288xbf16>
    %cst_101 = arith.constant dense<0.000000e+00> : vector<8x288xf32>
    %183 = tpu.matmul %180, %182, %cst_101 {dimension_numbers = #tpu.dot_dimension_numbers<[1], [0], [0], [1], [0, 0, 1, 1], [], []>} : vector<8x24xbf16>, vector<24x288xbf16>, vector<8x288xf32> -> vector<8x288xf32>
    %184 = arith.addf %178, %183 : vector<8x288xf32>
    %185 = vector.extract_strided_slice %141 {offsets = [7, 0, 0], sizes = [1, 8, 24], strides = [1, 1, 1]} : vector<9x8x24xbf16> to vector<1x8x24xbf16>
    %186 = vector.shape_cast %185 : vector<1x8x24xbf16> to vector<8x24xbf16>
    %c0_102 = arith.constant 0 : index
    %c37_103 = arith.constant 37 : index
    %187 = vector.load %arg8[%c0_102, %c37_103] : memref<32x342xf32, #tpu.memory_space<vmem>>, vector<24x288xf32>
    %188 = arith.truncf %187 : vector<24x288xf32> to vector<24x288xbf16>
    %cst_104 = arith.constant dense<0.000000e+00> : vector<8x288xf32>
    %189 = tpu.matmul %186, %188, %cst_104 {dimension_numbers = #tpu.dot_dimension_numbers<[1], [0], [0], [1], [0, 0, 1, 1], [], []>} : vector<8x24xbf16>, vector<24x288xbf16>, vector<8x288xf32> -> vector<8x288xf32>
    %190 = arith.addf %184, %189 : vector<8x288xf32>
    %191 = vector.extract_strided_slice %141 {offsets = [8, 0, 0], sizes = [1, 8, 24], strides = [1, 1, 1]} : vector<9x8x24xbf16> to vector<1x8x24xbf16>
    %192 = vector.shape_cast %191 : vector<1x8x24xbf16> to vector<8x24xbf16>
    %c0_105 = arith.constant 0 : index
    %c38_106 = arith.constant 38 : index
    %193 = vector.load %arg8[%c0_105, %c38_106] : memref<32x342xf32, #tpu.memory_space<vmem>>, vector<24x288xf32>
    %194 = arith.truncf %193 : vector<24x288xf32> to vector<24x288xbf16>
    %cst_107 = arith.constant dense<0.000000e+00> : vector<8x288xf32>
    %195 = tpu.matmul %192, %194, %cst_107 {dimension_numbers = #tpu.dot_dimension_numbers<[1], [0], [0], [1], [0, 0, 1, 1], [], []>} : vector<8x24xbf16>, vector<24x288xbf16>, vector<8x288xf32> -> vector<8x288xf32>
    %196 = arith.addf %190, %195 : vector<8x288xf32>
    %c2_108 = arith.constant 2 : index
    %c0_109 = arith.constant 0 : index
    %c0_110 = arith.constant 0 : index
    %197 = vector.load %arg3[%c2_108, %c0_109, %c0_110] : memref<3x8x1xf32, #tpu.memory_space<vmem>>, vector<1x8x1xf32>
    %198 = vector.shape_cast %197 : vector<1x8x1xf32> to vector<8x1xf32>
    %199 = vector.broadcast %198 : vector<8x1xf32> to vector<8x288xf32>
    %200 = arith.addf %196, %199 : vector<8x288xf32>
    %cst_111 = arith.constant 0.000000e+00 : f32
    %201 = vector.broadcast %cst_111 : f32 to vector<8x288xf32>
    %202 = arith.maximumf %200, %201 : vector<8x288xf32>
    %203 = vector.broadcast %7 : vector<1x288xf32> to vector<8x288xf32>
    %204 = arith.mulf %202, %203 : vector<8x288xf32>
    %c24 = arith.constant 24 : index
    %c19_112 = arith.constant 19 : index
    %205 = vector.load %arg8[%c24, %c19_112] : memref<32x342xf32, #tpu.memory_space<vmem>>, vector<8x288xf32>
    tpu.vector_store %arg8[%c24, %c19_112], %204 {strides = array<i32>} : memref<32x342xf32, #tpu.memory_space<vmem>>, vector<8x288xf32>,
    %c0_113 = arith.constant 0 : index
    %c19_114 = arith.constant 19 : index
    %206 = vector.load %arg8[%c0_113, %c19_114] : memref<32x342xf32, #tpu.memory_space<vmem>>, vector<32x288xf32>
    %207 = vector.extract_strided_slice %206 {offsets = [0, 0], sizes = [8, 288], strides = [1, 1]} : vector<32x288xf32> to vector<8x288xf32>
    %c0_115 = arith.constant 0 : index
    %c0_116 = arith.constant 0 : index
    %208 = vector.load %arg4[%c0_115, %c0_116] : memref<8x32xbf16, #tpu.memory_space<vmem>>, vector<8x32xbf16>
    %209 = arith.truncf %206 : vector<32x288xf32> to vector<32x288xbf16>
    %cst_117 = arith.constant dense<0.000000e+00> : vector<8x288xf32>
    %210 = tpu.matmul %208, %209, %cst_117 {dimension_numbers = #tpu.dot_dimension_numbers<[1], [0], [0], [1], [0, 0, 1, 1], [], []>} : vector<8x32xbf16>, vector<32x288xbf16>, vector<8x288xf32> -> vector<8x288xf32>
    %c0_118 = arith.constant 0 : index
    %c0_119 = arith.constant 0 : index
    %211 = vector.load %arg5[%c0_118, %c0_119] : memref<8x1xf32, #tpu.memory_space<vmem>>, vector<8x1xf32>
    %212 = vector.broadcast %211 : vector<8x1xf32> to vector<8x288xf32>
    %213 = arith.addf %210, %212 : vector<8x288xf32>
    %214 = arith.addf %213, %207 : vector<8x288xf32>
    %c0_120 = arith.constant 0 : index
    %c0_121 = arith.constant 0 : index
    %c0_122 = arith.constant 0 : index
    %215 = vector.load %arg7[%c0_120, %c0_121, %c0_122] : memref<1x8x288xf32, #tpu.memory_space<vmem>>, vector<1x8x288xf32>
    %216 = vector.shape_cast %215 : vector<1x8x288xf32> to vector<8x288xf32>
    %217 = vector.shape_cast %214 : vector<8x288xf32> to vector<1x8x288xf32>
    tpu.vector_store %arg7[%c0_120, %c0_121, %c0_122], %217 {strides = array<i32>} : memref<1x8x288xf32, #tpu.memory_space<vmem>>, vector<1x8x288xf32>,
    return
  }
  func.func @transform_0(%arg0: i32) -> (i32, i32, i32) {
    %c0_i32 = arith.constant 0 : i32
    %c0_i32_0 = arith.constant 0 : i32
    %c0_i32_1 = arith.constant 0 : i32
    return %arg0, %c0_i32, %c0_i32_0 : i32, i32, i32
  }
  func.func @transform_1(%arg0: i32) -> (i32, i32, i32, i32) {
    %c0_i32 = arith.constant 0 : i32
    %c0_i32_0 = arith.constant 0 : i32
    %c0_i32_1 = arith.constant 0 : i32
    %c0_i32_2 = arith.constant 0 : i32
    %c0_i32_3 = arith.constant 0 : i32
    return %c0_i32, %c0_i32_0, %c0_i32_1, %c0_i32_2 : i32, i32, i32, i32
  }
  func.func @transform_2(%arg0: i32) -> (i32, i32, i32) {
    %c0_i32 = arith.constant 0 : i32
    %c0_i32_0 = arith.constant 0 : i32
    %c0_i32_1 = arith.constant 0 : i32
    %c0_i32_2 = arith.constant 0 : i32
    return %c0_i32, %c0_i32_0, %c0_i32_1 : i32, i32, i32
  }
  func.func @transform_3(%arg0: i32) -> (i32, i32) {
    %c0_i32 = arith.constant 0 : i32
    %c0_i32_0 = arith.constant 0 : i32
    %c0_i32_1 = arith.constant 0 : i32
    return %c0_i32, %c0_i32_0 : i32, i32
  }
  func.func @transform_4(%arg0: i32) -> (i32, i32) {
    %c0_i32 = arith.constant 0 : i32
    %c0_i32_0 = arith.constant 0 : i32
    %c0_i32_1 = arith.constant 0 : i32
    return %c0_i32, %c0_i32_0 : i32, i32
  }
  func.func @transform_5(%arg0: i32) -> (i32, i32) {
    %c0_i32 = arith.constant 0 : i32
    %c0_i32_0 = arith.constant 0 : i32
    %c0_i32_1 = arith.constant 0 : i32
    return %c0_i32, %c0_i32_0 : i32, i32
  }
  func.func @transform_6(%arg0: i32) -> (i32, i32, i32) {
    %c0_i32 = arith.constant 0 : i32
    %c0_i32_0 = arith.constant 0 : i32
    %c0_i32_1 = arith.constant 0 : i32
    return %arg0, %c0_i32, %c0_i32_0 : i32, i32, i32
  }
}

</mosaic_0001>

<bundles_post_ra>
// kernel: tpu_custom_call.1
= control target key start
LH: loop header
LB: loop body
LE: loop exit
PB: predicated region body
PF: predicated region fallthrough
CT: control target
= control target key end

     0   :  { %s3386_s0 = inlined_call_operand.hbm [shape: f32[2,8,324], index: 0, kind: input, shape index: {}]   ;;  %s3387_s1 = inlined_call_operand.hbm [shape: bf16[3,9,8,24], index: 1, kind: input, shape index: {}]   ;;  %s3388_s2 = inlined_call_operand.vmem [shape: f32[3,8,1], index: 2, kind: input, shape index: {}]   ;;  %s3389_s3 = inlined_call_operand.vmem [shape: bf16[8,32], index: 3, kind: input, shape index: {}]   ;;  %s3390_s4 = inlined_call_operand.vmem [shape: f32[8,1], index: 4, kind: input, shape index: {}]   ;;  %s3391_s5 = inlined_call_operand.vmem [shape: f32[1,288], index: 5, kind: input, shape index: {}]   ;;  %s3392_s6 = inlined_call_operand.hbm [shape: f32[2,8,288], index: 6, kind: output, shape index: {}]  }
   0x1   :  { %3394 = sst [smem:[#allocation14_spill]] %s3387_s1 }
   0x2   :  { %11 = vsyncpa [#allocation4], 0 }
   0x3   :  { %13 = vsyncpa [#allocation4 + $0x1], 0 }
   0x4   :  { %14 = vsyncpa [#allocation7], 0 }
   0x5   :  { %15 = vsyncpa [#allocation5], 0 }
   0x6   :  { %17 = vsyncpa [#allocation5 + $0x1], 0  ;;  %s2727_s21 = smov 0   ;;  %s2729_s22 = smov 0  }
   0x7   :  { %s2731_s23 = smov 0   ;;  %s2733_s24 = smov 0  }
   0x8 LB: > { %3395 = sst [smem:[#allocation12_spill]] %s2672_s23  ;;  %s2751_s28 = sadd.s32 4294967295, %s2676_s24   ;;  %s2676_s24 = sphi %s2733_s24, %s3408_s24   ;;  %s2672_s23 = sphi %s2731_s23, %s3405_s23   ;;  %s2668_s22 = sphi %s2729_s22, %s3407_s22   ;;  %s2664_s21 = sphi %s2727_s21, %s3406_s21  }
   0x9   : > { %s3396_s1 = sld [smem:[#allocation14_spill]]  ;;  %p2374_p0 = scmp.ge.s32.totalorder %s2676_s24, 1 }
   0xa   : > { %p44_p1 = scmp.eq.s32.totalorder %s2751_s28, 0  ;;  %p185_p2 = scmp.lt.s32.totalorder %s2676_s24, 3 }
   0xb   : > { %s2678_s30 = smov [#allocation6]   ;;  %s2679_s8 = smov 64  }
   0xc   : > { %p2756_p3 = pnand %p2374_p0, %p185_p2  ;;  %s198_s7 = sshll.u32 %s2678_s30, 4  ;;  %s199_s7 = int_to_ptr.vmem [resolvable:$true] %s198_s7 }
   0xd   : > { %s2680_s9 = smov 4   ;;  %s2373_s10 = sadd.s32 4294967294, %s2676_s24  }
   0xe   : > { %p2481_p4 = pneg %p2756_p3  ;;  %s2767_s11 = sadd.s32 1, %s2676_s24  }
   0xf   : > { %s196_s27 = sshll.u32 %s3396_s1, 4  ;;  %s30_s12 = sadd.s32 1, %s2672_s23  ;;  %s197_s27 = int_to_ptr.hbm [resolvable:$true] %s196_s27 }
  0x10   : > { %p2482_p6 = pnand %p2481_p4, %p44_p1  ;;  %s27_s13 = ssub.s32 %s2676_s24, %s2767_s11 }
  0x11   : > { %p37_p7 = scmp.ne.s32.totalorder %s2672_s23, %s2668_s22  ;;  %p28_p8 = scmp.eq.s32.totalorder %s27_s13, 0 }
  0x12   : > { %2484 = dma.hbm_to_vmem [thread:$0]  (!%p2482_p6), %s197_s27, 1728, %s199_s7, [#allocation7], %s2679_s8, %s2679_s8, %s2680_s9  }
  0x13   : > { %p38_p9 = scmp.eq.s32.totalorder %s2676_s24, 0  ;;  %p43_p10 = scmp.ne.s32.totalorder %s2668_s22, %s2664_s21 }
  0x14   : > { %p172_p11 = scmp.eq.s32.totalorder %s2751_s28, 1  ;;  %p178_p2 = scmp.eq.s32.totalorder %s2373_s10, 1 }
  0x15   : > { %s2779_s14 = scalar_select %p28_p8, %s2672_s23, %s30_s12  }
  0x16   : > { %p39_p12 = por %p38_p9, %p37_p7  ;;  %p2783_p13 = por %p44_p1, %p43_p10 }
  0x17   : > { %3398 = sst [smem:[#allocation13_spill]] %s2779_s14  ;;  %p2787_p0 = por %p172_p11, %p37_p7 }
  0x18   : > { %p2494_p4 = scmp.lt.s32.totalorder %s2676_s24, 2  ;;  %s224_s17 = sand.u32 1, %s2672_s23  }
  0x19   : > { %p2793_p6 = por %p178_p2, %p43_p10  ;;  %s2469_s19 = smul.u32 24, %s224_s17 }
  0x1a   : > { %p2797_p8 = pnand %p2494_p4, %p39_p12  ;;  %s2470_s25 = smul.u32 24, %s2676_s24 }
  0x1b   : > { %s228_s7 = scalar_lea.vmem [#allocation3], %s2469_s19  ;;  %s225_s10 = scalar_lea.sflag [#allocation4], %s224_s17 }
  0x1c   : > { %s233_s30 = scalar_lea.hbm %s3386_s0, %s2470_s25  ;;  %s237_s8 = sshll.u32 %s228_s7, 4  ;;  %s238_s8 = int_to_ptr.vmem [resolvable:$true] %s237_s8 }
  0x1d   : > { %s235_s9 = sshll.u32 %s233_s30, 4  ;;  %p2580_p9 = pneg %p2797_p8  ;;  %s236_s9 = int_to_ptr.hbm [resolvable:$true] %s235_s9 }
  0x1e   : > { %s2576_s12 = sshra.s32 %s236_s9, 4  ;;  %s2583_s23 = scalar_lea.hbm %s3386_s0, 48  ;;  %s2577_s12 = int_to_ptr.hbm [resolvable:$true] %s2576_s12 }
  0x1f   : > { %s2578_s13 = scalar_lea.hbm %s2577_s12, 24  ;;  %p2584_p12 = scmp.lt.s32.totalorder %s2577_s12, %s3386_s0 }
  0x20   : > { %p2579_p7 = scmp.ne.s32.totalorder %s2577_s12, %s2578_s13  ;;  %p2585_p2 = scmp.lt.s32.totalorder %s2583_s23, %s2578_s13 }
  0x22   : > { %p2581_p10 = pnand %p2580_p9, %p2579_p7  ;;  %p2586_p4 = por %p2585_p2, %p2584_p12 }
  0x24   : > { %p2582_p11 = pneg %p2581_p10 }
  0x26   : > { %p2587_p5 = pnand %p2586_p4, %p2582_p11 }
  0x28   : > { %2590 = shalt.err (!%p2587_p5)
}
  0x29   : > { %2488 = dma.hbm_to_vmem [thread:$0]  (!%p2797_p8), %s236_s9, 384, %s238_s8, %s225_s10  }
  0x2a   : > { %246 = sbr.rel (%p2756_p3) target bundleno = 1768 (0x6e8), region = 44  ;;  %s2818_s17 = sand.u32 (!%p2756_p3), 1, %s2668_s22  }
  0x2b   : > { %s2471_s1 = smul.u32 (!%p2756_p3), 24, %s2818_s17  ;;  %s249_s14 = scalar_lea.sflag (!%p2756_p3), [#allocation4], %s2818_s17 }
  0x2d   : > { %s252_s23 = scalar_lea.vmem (!%p2756_p3), [#allocation3], %s2471_s1 }
  0x2f   : > { %2651 = dma.done.wait (%p2783_p13), %s249_s14, 384  }
  0x30   : > { %2653 = vsyncadd (%p2783_p13), %s249_s14, 4294966912 }
  0x31   : > { %2655 = dma.done.wait (%p44_p1), [#allocation7], 1728  }
  0x32   : > { %2657 = vsyncadd (%p44_p1), [#allocation7], 4294965568  ;;  %vm293_vm0 = vcmask 703888   ;;  %v2681_v0 = vmov 0.0   ;;  %vm288_vm1 = vcmask 154624   ;;  %vm303_vm2 = vcmask 556032  }
  0x33   : > { %294 = vst.msk [vmem:[#allocation2 + $0x10] sm:$0xff] %vm293_vm0, %v2681_v0  ;;  %v300_v1 = vld [vmem:[%s252_s23 + $0x10] sm:$0xff]  ;;  %v2834_v2 = vld [vmem:[%s252_s23] sm:$0xff]  ;;  %v2837_v3 = vld [vmem:[%s252_s23 + $0x8] sm:$0xff]  ;;  %s2682_s29 = smov 127   ;;  %s2683_s15 = smov 126  }
  0x34   : > { %295 = vst.msk [vmem:[#allocation2 + $0x28] sm:$0xff] %vm293_vm0, %v2681_v0  ;;  %v318_v4 = vpack.c.bf16 %v2834_v2, %v2834_v2  ;;  %v319_v5 = vpack.c.bf16 %v2837_v3, %v2837_v3  ;;  %s2684_s19 = smov 110   ;;  %s2685_s20 = smov 109   ;;  %vm337_vm3 = vcmask 1043456   ;;  %vm333_vm4 = vcmask 64512  }
  0x35   : > { %296 = vst.msk [vmem:[#allocation2 + $0x40] sm:$0xff] %vm293_vm0, %v2681_v0  ;;  %s2686_s27 = smov 108   ;;  %s2687_s30 = smov 92   ;;  %v306_v9 = vld [vmem:[#allocation6] sm:$0xf]  ;;  %vm443_vm5 = vcmask 1031168  }
  0x36   : > { %297 = vst.msk [vmem:[#allocation2 + $0x58] sm:$0xff] %vm293_vm0, %v2681_v0  ;;  %324 = vrot.lane.b32.xlu0 %v318_v4, %s2682_s29  ;;  %439 = vrot.lane.b32.xlu2 %v319_v5, %s2683_s15  ;;  %s2688_s7 = smov 91   ;;  %s2689_s8 = smov 90   ;;  %v390_v8 = vsel %vm337_vm3, %v318_v4, 0  ;;  %v2878_v14 = vld [vmem:[#allocation6 + $0x8] sm:$0xf] }
  0x37   : > { %289 = vst.msk [vmem:[#allocation2] sm:$0xff] %vm288_vm1, %v2681_v0  ;;  %405 = vmatpush.bf16.msra.mxu3 %v390_v8  ;;  %vm330_vm6 = vcmask 1039360   ;;  %v2883_v18 = vld [vmem:[#allocation6 + $0xc] sm:$0xf]  ;;  %v393_v21 = vsel %vm337_vm3, %v319_v5, 0  ;;  %vm506_vm7 = vcmask 900096  }
  0x38   : > { %290 = vst.msk [vmem:[#allocation2 + $0x18] sm:$0xff] %vm288_vm1, %v2681_v0  ;;  %v307_v26 = vld [vmem:[#allocation6 + $0x4] sm:$0xf]  ;;  %vm569_vm8 = vcmask 891904   ;;  %vm632_vm9 = vcmask 883712   ;;  %vm695_vm10 = vcmask 752640  }
  0x39   : > { %291 = vst.msk [vmem:[#allocation2 + $0x30] sm:$0xff] %vm288_vm1, %v2681_v0  ;;  %v311_v54 = vld [vmem:[#allocation6 + $0x14] sm:$0xf]  ;;  %vm758_vm11 = vcmask 744448   ;;  %vm821_vm12 = vcmask 736256   ;;  %s2691_s26 = smov 19  }
  0x3a   : > { %304 = vst.msk [vmem:[#allocation2 + $0x10] sm:$0xff] %vm303_vm2, %v300_v1  ;;  %2383 = vmatmul.msk.bf16.vlgmr.msra.gmra.mxu3 %vm333_vm4, %v306_v9  ;;  %vm914_vm13 = vcmask 1047704   ;;  %vm917_vm14 = vcmask 416768   ;;  %vm952_vm15 = vcmask 130048   ;;  %vm1512_vm0 = vcmask 195584   ;;  %s2626_s23 = scalar_lea.hbm %s3392_s6, 48 }
  0x3b   : > { %301 = vst [vmem:[#allocation2] sm:$0xff] %v2834_v2 }
  0x3c   : > { %292 = vst.msk [vmem:[#allocation2 + $0x48] sm:$0xff] %vm288_vm1, %v2681_v0 }
  0x3d   : > { %302 = vst [vmem:[#allocation2 + $0x8] sm:$0xff] %v2837_v3 }
  0x3e   : > { %326 = vrot.lane.b32.xlu0 %v319_v5, %s2682_s29 }
  0x41   : > { %v2848_v6 = vld [vmem:[#allocation2 + $0x10] sm:$0xff] }
  0x42   : > { %v320_v7 = vpack.c.bf16 %v2848_v6, %v2848_v6 }
  0x44   : > { %328 = vrot.lane.b32.xlu1 %v320_v7, %s2682_s29  ;;  %441 = vrot.lane.b32.xlu2 %v320_v7, %s2683_s15  ;;  %v396_v25 = vsel %vm337_vm3, %v320_v7, 0 }
  0x46   : > { %500 = vrot.lane.b32.xlu0 %v318_v4, %s2684_s19 }
  0x4c   : > { %437 = vrot.lane.b32.xlu1 %v318_v4, %s2683_s15  ;;  %504 = vrot.lane.b32.xlu2 %v320_v7, %s2684_s19 }
  0x4e   : > { %563 = vrot.lane.b32.xlu0 %v318_v4, %s2685_s20 }
  0x54   : > { %502 = vrot.lane.b32.xlu1 %v319_v5, %s2684_s19  ;;  %567 = vrot.lane.b32.xlu2 %v320_v7, %s2685_s20 }
  0x56   : > { %626 = vrot.lane.b32.xlu0 %v318_v4, %s2686_s27 }
  0x5c   : > { %565 = vrot.lane.b32.xlu1 %v319_v5, %s2685_s20  ;;  %630 = vrot.lane.b32.xlu2 %v320_v7, %s2686_s27 }
  0x5e   : > { %689 = vrot.lane.b32.xlu0 %v318_v4, %s2687_s30 }
  0x64   : > { %628 = vrot.lane.b32.xlu1 %v319_v5, %s2686_s27  ;;  %693 = vrot.lane.b32.xlu2 %v320_v7, %s2687_s30 }
  0x66   : > { %752 = vrot.lane.b32.xlu0 %v318_v4, %s2688_s7 }
  0x6c   : > { %691 = vrot.lane.b32.xlu1 %v319_v5, %s2687_s30  ;;  %756 = vrot.lane.b32.xlu2 %v320_v7, %s2688_s7 }
  0x6e   : > { %815 = vrot.lane.b32.xlu0 %v318_v4, %s2689_s8 }
  0x74   : > { %754 = vrot.lane.b32.xlu1 %v319_v5, %s2688_s7  ;;  %819 = vrot.lane.b32.xlu2 %v320_v7, %s2689_s8  ;;  %v310_v7 = vld [vmem:[#allocation6 + $0x10] sm:$0xf] }
  0x7c   : > { %817 = vrot.lane.b32.xlu1 %v319_v5, %s2689_s8 }
  0x90   : > { %v440_v10 = vpop.permute.xlu2 %439 }
  0x9e   : > { %v442_v11 = vpop.permute.xlu2 %441 }
  0x9f   : > { %v445_v12 = vsel %vm443_vm5, %v440_v10, %v442_v11  ;;  %v456_v29 = vsel %vm337_vm3, %v442_v11, 0 }
  0xa0   : > { %v453_v13 = vsel %vm337_vm3, %v445_v12, 0 }
  0xa1   : > { %478 = vmatpush.bf16.msrb.mxu3 %v453_v13 }
  0xa4   : > { %2387 = vmatmul.msk.bf16.vlgmr.msrb.gmra.mxu3 %vm333_vm4, %v2878_v14 }
  0xa6   : > { %v505_v15 = vpop.permute.xlu2 %504 }
  0xa7   : > { %v519_v16 = vsel %vm337_vm3, %v505_v15, 0 }
  0xa8   : > { %v325_v17 = vpop.permute.xlu0 %324  ;;  %554 = vmatpush.bf16.msra.mxu3 %v519_v16 }
  0xae   : > { %v568_v34 = vpop.permute.xlu2 %567 }
  0xaf   : > { %v582_v41 = vsel %vm337_vm3, %v568_v34, 0 }
  0xb0   : > { %v327_v20 = vpop.permute.xlu0 %326 }
  0xb1   : > { %v331_v23 = vsel %vm330_vm6, %v325_v17, %v327_v20 }
  0xb2   : > { %v339_v27 = vsel %vm337_vm3, %v331_v23, 0  ;;  %v2690_v23 = vmov 0  }
  0xb3   : > { %354 = vmatpush.bf16.msra.mxu0 %v339_v27  ;;  %2543 = vset.pattern.permute.xlu0 %v2690_v23 }
  0xb4   : > { %2391 = vmatmul.msk.bf16.vlgmr.msra.gmra.mxu3 %vm333_vm4, %v2883_v18  ;;  %2544 = vset.pattern.permute.xlu2 %v2690_v23 }
  0xb5   : > { %2545 = vset.pattern.permute.xlu1 %v2690_v23 }
  0xb6   : > { %v329_v19 = vpop.permute.xlu1 %328  ;;  %2380 = vmatmul.msk.bf16.vlgmr.msra.gmra.mxu0 %vm333_vm4, %v307_v26  ;;  %v631_v42 = vpop.permute.xlu2 %630 }
  0xb7   : > { %v345_v22 = vsel %vm337_vm3, %v329_v19, 0  ;;  %v332_v24 = vsel %vm330_vm6, %v327_v20, %v329_v19  ;;  %418 = vmatpush.bf16.msrb.mxu0 %v393_v21  ;;  %v645_v56 = vsel %vm337_vm3, %v631_v42, 0 }
  0xb8   : > { %380 = vmatpush.bf16.msra.mxu2 %v345_v22  ;;  %v342_v28 = vsel %vm337_vm3, %v332_v24, 0  ;;  %v501_v33 = vpop.permute.xlu0 %500  ;;  %v878_v22 = vld [vmem:[%s3388_s2] sm:$0xff]  ;;  %v314_v24 = vld [vmem:[#allocation6 + $0x20] sm:$0xf] }
  0xb9   : > { %367 = vmatpush.bf16.msra.mxu1 %v342_v28  ;;  %881 = vperm.xlu0 %2543, %v878_v22  }
  0xbb   : > { %2382 = vmatmul.msk.bf16.vlgmr.msra.gmra.mxu2 %vm333_vm4, %v307_v26  ;;  %491 = vmatpush.bf16.msra.mxu0 %v456_v29 }
  0xbc   : > { %2381 = vmatmul.msk.bf16.vlgmr.msra.gmra.mxu1 %vm333_vm4, %v307_v26 }
  0xbd   : > { %431 = vmatpush.bf16.msrb.mxu1 %v396_v25  ;;  %v407_v25 = vpop.f32.mrf.mxu3 }
  0xbe   : > { %v438_v30 = vpop.permute.xlu1 %437  ;;  %v694_v49 = vpop.permute.xlu2 %693 }
  0xbf   : > { %v444_v31 = vsel %vm443_vm5, %v438_v30, %v440_v10  ;;  %v708_v11 = vsel %vm337_vm3, %v694_v49, 0 }
  0xc0   : > { %v450_v32 = vsel %vm337_vm3, %v444_v31, 0  ;;  %v564_v40 = vpop.permute.xlu0 %563 }
  0xc1   : > { %465 = vmatpush.bf16.msrb.mxu2 %v450_v32 }
  0xc5   : > { %v409_v26 = vpop.f32.mrf.mxu3 }
  0xc6   : > { %v503_v35 = vpop.permute.xlu1 %502  ;;  %2384 = vmatmul.msk.bf16.vlgmr.msrb.gmra.mxu0 %vm333_vm4, %v306_v9  ;;  %v757_v58 = vpop.permute.xlu2 %756 }
  0xc7   : > { %v508_v36 = vsel %vm506_vm7, %v503_v35, %v505_v15  ;;  %v507_v37 = vsel %vm506_vm7, %v501_v33, %v503_v35  ;;  %v771_v62 = vsel %vm337_vm3, %v757_v58, 0 }
  0xc8   : > { %v516_v38 = vsel %vm337_vm3, %v508_v36, 0  ;;  %v513_v39 = vsel %vm337_vm3, %v507_v37, 0  ;;  %v627_v48 = vpop.permute.xlu0 %626 }
  0xc9   : > { %541 = vmatpush.bf16.msra.mxu2 %v516_v38  ;;  %528 = vmatpush.bf16.msra.mxu1 %v513_v39 }
  0xcb   : > { %2386 = vmatmul.msk.bf16.vlgmr.msrb.gmra.mxu2 %vm333_vm4, %v2878_v14 }
  0xcc   : > { %2385 = vmatmul.msk.bf16.vlgmr.msrb.gmra.mxu1 %vm333_vm4, %v306_v9  ;;  %v312_v9 = vld [vmem:[#allocation6 + $0x18] sm:$0xf] }
  0xcd   : > { %617 = vmatpush.bf16.msrb.mxu2 %v582_v41 }
  0xce   : > { %v566_v43 = vpop.permute.xlu1 %565  ;;  %v820_v13 = vpop.permute.xlu2 %819 }
  0xcf   : > { %v570_v44 = vsel %vm569_vm8, %v564_v40, %v566_v43  ;;  %v571_v45 = vsel %vm569_vm8, %v566_v43, %v568_v34  ;;  %v834_v19 = vsel %vm337_vm3, %v820_v13, 0 }
  0xd0   : > { %v576_v46 = vsel %vm337_vm3, %v570_v44, 0  ;;  %v579_v47 = vsel %vm337_vm3, %v571_v45, 0  ;;  %v690_v57 = vpop.permute.xlu0 %689 }
  0xd1   : > { %591 = vmatpush.bf16.msrb.mxu0 %v576_v46  ;;  %604 = vmatpush.bf16.msrb.mxu1 %v579_v47 }
  0xd6   : > { %v629_v50 = vpop.permute.xlu1 %628  ;;  %2388 = vmatmul.msk.bf16.vlgmr.msra.gmra.mxu0 %vm333_vm4, %v2878_v14 }
  0xd7   : > { %v633_v51 = vsel %vm632_vm9, %v627_v48, %v629_v50  ;;  %v634_v52 = vsel %vm632_vm9, %v629_v50, %v631_v42 }
  0xd8   : > { %v639_v53 = vsel %vm337_vm3, %v633_v51, 0  ;;  %v642_v55 = vsel %vm337_vm3, %v634_v52, 0  ;;  %v753_v4 = vpop.permute.xlu0 %752 }
  0xd9   : > { %654 = vmatpush.bf16.msrb.mxu3 %v639_v53  ;;  %667 = vmatpush.bf16.msra.mxu0 %v642_v55 }
  0xdb   : > { %2390 = vmatmul.msk.bf16.vlgmr.msra.gmra.mxu2 %vm333_vm4, %v2883_v18 }
  0xdc   : > { %2389 = vmatmul.msk.bf16.vlgmr.msra.gmra.mxu1 %vm333_vm4, %v2883_v18  ;;  %2395 = vmatmul.msk.bf16.vlgmr.msrb.gmra.mxu3 %vm333_vm4, %v311_v54  ;;  %v313_v18 = vld [vmem:[#allocation6 + $0x1c] sm:$0xf] }
  0xdd   : > { %680 = vmatpush.bf16.msra.mxu1 %v645_v56 }
  0xde   : > { %v692_v59 = vpop.permute.xlu1 %691 }
  0xdf   : > { %v696_v60 = vsel %vm695_vm10, %v690_v57, %v692_v59  ;;  %v697_v61 = vsel %vm695_vm10, %v692_v59, %v694_v49 }
  0xe0   : > { %v702_v63 = vsel %vm337_vm3, %v696_v60, 0  ;;  %v705_v0 = vsel %vm337_vm3, %v697_v61, 0  ;;  %v816_v15 = vpop.permute.xlu0 %815 }
  0xe1   : > { %717 = vmatpush.bf16.msra.mxu2 %v702_v63  ;;  %730 = vmatpush.bf16.msra.mxu3 %v705_v0 }
  0xe5   : > { %806 = vmatpush.bf16.msrb.mxu3 %v771_v62 }
  0xe6   : > { %v755_v1 = vpop.permute.xlu1 %754  ;;  %2392 = vmatmul.msk.bf16.vlgmr.msrb.gmra.mxu0 %vm333_vm4, %v310_v7 }
  0xe7   : > { %v760_v5 = vsel %vm758_vm11, %v755_v1, %v757_v58  ;;  %v759_v8 = vsel %vm758_vm11, %v753_v4, %v755_v1  ;;  %743 = vmatpush.bf16.msrb.mxu0 %v708_v11 }
  0xe8   : > { %v768_v10 = vsel %vm337_vm3, %v760_v5, 0  ;;  %v765_v12 = vsel %vm337_vm3, %v759_v8, 0 }
  0xeb   : > { %2394 = vmatmul.msk.bf16.vlgmr.msrb.gmra.mxu2 %vm333_vm4, %v310_v7 }
  0xec   : > { %2393 = vmatmul.msk.bf16.vlgmr.msrb.gmra.mxu1 %vm333_vm4, %v310_v7  ;;  %2399 = vmatmul.msk.bf16.vlgmr.msra.gmra.mxu3 %vm333_vm4, %v312_v9 }
  0xed   : > { %793 = vmatpush.bf16.msrb.mxu2 %v768_v10  ;;  %780 = vmatpush.bf16.msrb.mxu1 %v765_v12 }
  0xee   : > { %v818_v14 = vpop.permute.xlu1 %817 }
  0xef   : > { %v823_v16 = vsel %vm821_vm12, %v818_v14, %v820_v13  ;;  %v822_v17 = vsel %vm821_vm12, %v816_v15, %v818_v14 }
  0xf0   : > { %v831_v20 = vsel %vm337_vm3, %v823_v16, 0  ;;  %v828_v21 = vsel %vm337_vm3, %v822_v17, 0 }
  0xf6   : > { %2396 = vmatmul.msk.bf16.vlgmr.msra.gmra.mxu0 %vm333_vm4, %v311_v54 }
  0xf7   : > { %843 = vmatpush.bf16.msra.mxu0 %v828_v21 }
  0xfb   : > { %2398 = vmatmul.msk.bf16.vlgmr.msra.gmra.mxu2 %vm333_vm4, %v312_v9 }
  0xfc   : > { %2397 = vmatmul.msk.bf16.vlgmr.msra.gmra.mxu1 %vm333_vm4, %v311_v54  ;;  %2403 = vmatmul.msk.bf16.vlgmr.msrb.gmra.mxu3 %vm333_vm4, %v313_v18 }
  0xfd   : > { %869 = vmatpush.bf16.msra.mxu2 %v834_v19  ;;  %856 = vmatpush.bf16.msra.mxu1 %v831_v20 }
 0x106   : > { %2400 = vmatmul.msk.bf16.vlgmr.msrb.gmra.mxu0 %vm333_vm4, %v312_v9 }
 0x10b   : > { %2402 = vmatmul.msk.bf16.vlgmr.msrb.gmra.mxu2 %vm333_vm4, %v313_v18 }
 0x10c   : > { %2401 = vmatmul.msk.bf16.vlgmr.msrb.gmra.mxu1 %vm333_vm4, %v313_v18 }
 0x116   : > { %2404 = vmatmul.msk.bf16.vlgmr.msra.gmra.mxu0 %vm333_vm4, %v314_v24 }
 0x11b   : > { %2406 = vmatmul.msk.bf16.vlgmr.msra.gmra.mxu2 %vm333_vm4, %v314_v24 }
 0x11c   : > { %2405 = vmatmul.msk.bf16.vlgmr.msra.gmra.mxu1 %vm333_vm4, %v314_v24 }
 0x127   : > { %v480_v27 = vpop.f32.mrf.mxu3 }
 0x12f   : > { %v482_v28 = vpop.f32.mrf.mxu3 }
 0x133   : > { %v356_v29 = vpop.f32.mrf.mxu0 }
 0x134   : > { %v408_v31 = vadd.f32 %v407_v25, %v356_v29 }
 0x137   : > { %v556_v32 = vpop.f32.mrf.mxu3 }
 0x139   : > { %v369_v30 = vpop.f32.mrf.mxu1 }
 0x13b   : > { %v358_v34 = vpop.f32.mrf.mxu0 }
 0x13e   : > { %v382_v33 = vpop.f32.mrf.mxu2 }
 0x13f   : > { %v558_v36 = vpop.f32.mrf.mxu3 }
 0x141   : > { %v371_v35 = vpop.f32.mrf.mxu1 }
 0x142   : > { %v305_v35 = vld [vmem:[%s3391_s5] sm:$0x7] }
 0x143   : > { %v420_v38 = vpop.f32.mrf.mxu0 }
 0x144   : > { %v421_v40 = vadd.f32 %v420_v38, %v369_v30 }
 0x146   : > { %v384_v37 = vpop.f32.mrf.mxu2  ;;  %v498_v42 = vadd.f32 %v480_v27, %v421_v40  ;;  %v2960_v40 = vperm.slane %v305_v35, 1 }
 0x149   : > { %v433_v39 = vpop.f32.mrf.mxu1 }
 0x14a   : > { %v434_v41 = vadd.f32 %v433_v39, %v382_v33 }
 0x14b   : > { %v422_v44 = vpop.f32.mrf.mxu0 }
 0x14e   : > { %v467_v43 = vpop.f32.mrf.mxu2 }
 0x14f   : > { %v497_v14 = vadd.f32 %v467_v43, %v408_v31 }
 0x151   : > { %v435_v45 = vpop.f32.mrf.mxu1 }
 0x153   : > { %v493_v47 = vpop.f32.mrf.mxu0 }
 0x154   : > { %v499_v49 = vadd.f32 %v493_v47, %v434_v41  ;;  %v2962_v41 = vperm.slane %v305_v35, 0 }
 0x156   : > { %v469_v46 = vpop.f32.mrf.mxu2  ;;  %v562_v50 = vadd.f32 %v556_v32, %v499_v49  ;;  %v882_v32 = vpop.permute.xlu0 %881 }
 0x159   : > { %v530_v48 = vpop.f32.mrf.mxu1 }
 0x15a   : > { %v560_v16 = vadd.f32 %v530_v48, %v497_v14 }
 0x15b   : > { %v495_v53 = vpop.f32.mrf.mxu0 }
 0x15c   : > { %v2968_v53 = vperm.slane %v305_v35, 2 }
 0x15e   : > { %v543_v51 = vpop.f32.mrf.mxu2 }
 0x15f   : > { %v656_v52 = vpop.f32.mrf.mxu3  ;;  %v561_v15 = vadd.f32 %v543_v51, %v498_v42 }
 0x161   : > { %v532_v54 = vpop.f32.mrf.mxu1 }
 0x163   : > { %v593_v57 = vpop.f32.mrf.mxu0 }
 0x164   : > { %v623_v18 = vadd.f32 %v593_v57, %v560_v16 }
 0x166   : > { %v545_v55 = vpop.f32.mrf.mxu2  ;;  %v686_v23 = vadd.f32 %v656_v52, %v623_v18 }
 0x167   : > { %v658_v56 = vpop.f32.mrf.mxu3 }
 0x169   : > { %v606_v58 = vpop.f32.mrf.mxu1 }
 0x16a   : > { %v624_v19 = vadd.f32 %v606_v58, %v561_v15 }
 0x16b   : > { %v595_v61 = vpop.f32.mrf.mxu0 }
 0x16e   : > { %v619_v59 = vpop.f32.mrf.mxu2 }
 0x16f   : > { %v732_v60 = vpop.f32.mrf.mxu3  ;;  %v625_v24 = vadd.f32 %v619_v59, %v562_v50 }
 0x171   : > { %v608_v62 = vpop.f32.mrf.mxu1 }
 0x173   : > { %v669_v1 = vpop.f32.mrf.mxu0 }
 0x174   : > { %v687_v22 = vadd.f32 %v669_v1, %v624_v19 }
 0x176   : > { %v621_v63 = vpop.f32.mrf.mxu2  ;;  %v750_v26 = vadd.f32 %v732_v60, %v687_v22 }
 0x177   : > { %v734_v0 = vpop.f32.mrf.mxu3 }
 0x179   : > { %v682_v4 = vpop.f32.mrf.mxu1 }
 0x17a   : > { %v688_v28 = vadd.f32 %v682_v4, %v625_v24 }
 0x17b   : > { %v671_v8 = vpop.f32.mrf.mxu0 }
 0x17e   : > { %v719_v5 = vpop.f32.mrf.mxu2 }
 0x17f   : > { %v808_v7 = vpop.f32.mrf.mxu3  ;;  %v749_v25 = vadd.f32 %v719_v5, %v686_v23 }
 0x181   : > { %v684_v9 = vpop.f32.mrf.mxu1 }
 0x183   : > { %v745_v12 = vpop.f32.mrf.mxu0 }
 0x184   : > { %v751_v33 = vadd.f32 %v745_v12, %v688_v28  ;;  %v923_v28 = vld [vmem:[#allocation6 + $0x30] sm:$0xf] }
 0x186   : > { %v721_v10 = vpop.f32.mrf.mxu2  ;;  %v814_v42 = vadd.f32 %v808_v7, %v751_v33  ;;  %v921_v7 = vld [vmem:[#allocation6 + $0x28] sm:$0xf] }
 0x187   : > { %v810_v11 = vpop.f32.mrf.mxu3 }
 0x189   : > { %v782_v13 = vpop.f32.mrf.mxu1 }
 0x18a   : > { %v812_v30 = vadd.f32 %v782_v13, %v749_v25 }
 0x18b   : > { %v747_v20 = vpop.f32.mrf.mxu0 }
 0x18c   : > { %v922_v20 = vld [vmem:[#allocation6 + $0x2c] sm:$0xf] }
 0x18e   : > { %v795_v17 = vpop.f32.mrf.mxu2 }
 0x18f   : > { %v813_v29 = vadd.f32 %v795_v17, %v750_v26 }
 0x191   : > { %v784_v21 = vpop.f32.mrf.mxu1 }
 0x193   : > { %v845_v34 = vpop.f32.mrf.mxu0 }
 0x194   : > { %v875_v36 = vadd.f32 %v845_v34, %v812_v30  ;;  %v924_v34 = vld [vmem:[#allocation6 + $0x34] sm:$0xf] }
 0x196   : > { %v797_v27 = vpop.f32.mrf.mxu2  ;;  %v884_v38 = vadd.f32 %v882_v32, %v875_v36 }
 0x198   : > { %v887_v44 = vmax.f32 %v884_v38, 0.0  ;;  %v925_v38 = vld [vmem:[#allocation6 + $0x38] sm:$0xf] }
 0x199   : > { %v858_v31 = vpop.f32.mrf.mxu1 }
 0x19a   : > { %v876_v37 = vadd.f32 %v858_v31, %v813_v29  ;;  %v897_v48 = vmul.f32 %v2962_v41, %v887_v44 }
 0x19b   : > { %v847_v50 = vpop.f32.mrf.mxu0 }
 0x19c   : > { %v885_v39 = vadd.f32 %v882_v32, %v876_v37  ;;  %903 = vrot.lane.b32.xlu1 %v897_v48, %s2691_s26  ;;  %v926_v48 = vld [vmem:[#allocation6 + $0x3c] sm:$0xf] }
 0x19e   : > { %v871_v43 = vpop.f32.mrf.mxu2  ;;  %v888_v45 = vmax.f32 %v885_v39, 0.0 }
 0x19f   : > { %v877_v46 = vadd.f32 %v871_v43, %v814_v42 }
 0x1a0   : > { %v898_v47 = vmul.f32 %v2960_v40, %v888_v45 }
 0x1a1   : > { %v886_v49 = vadd.f32 %v882_v32, %v877_v46  ;;  %v860_v51 = vpop.f32.mrf.mxu1 }
 0x1a2   : > { %905 = vrot.lane.b32.xlu2 %v898_v47, %s2691_s26  ;;  %v927_v51 = vld [vmem:[#allocation6 + $0x40] sm:$0xf] }
 0x1a3   : > { %v889_v52 = vmax.f32 %v886_v49, 0.0 }
 0x1a5   : > { %v899_v55 = vmul.f32 %v2968_v53, %v889_v52  ;;  %v928_v52 = vld [vmem:[#allocation6 + $0x44] sm:$0xf] }
 0x1a6   : > { %v873_v54 = vpop.f32.mrf.mxu2 }
 0x1a7   : > { %907 = vrot.lane.b32.xlu1 %v899_v55, %s2691_s26  ;;  %v2434_v55 = vld [vmem:[%s3388_s2 + $0x8] sm:$0xff] }
 0x1fc   : > { %v906_v56 = vpop.permute.xlu2 %905 }
 0x20e   : > { %v904_v57 = vpop.permute.xlu1 %903 }
 0x20f   : > { %v909_v58 = vsel %vm288_vm1, %v904_v57, %v906_v56  ;;  %915 = vst.msk [vmem:[#allocation2 + $0x18] sm:$0xff] %vm914_vm13, %v904_v57 }
 0x210   : > { %916 = vst [vmem:[#allocation2 + $0x20] sm:$0xff] %v909_v58  ;;  %v2975_v59 = vpack.c.bf16 %v909_v58, %v2837_v3 }
 0x212   : > { %943 = vrot.lane.b32.xlu0 %v2975_v59, %s2682_s29 }
 0x216   : > { %v932_v60 = vld [vmem:[#allocation2 + $0x18] sm:$0xff] }
 0x217   : > { %v2980_v62 = vpack.c.bf16 %v932_v60, %v2834_v2  ;;  %v920_v2 = vld [vmem:[#allocation6 + $0x24] sm:$0xf] }
 0x219   : > { %v908_v61 = vpop.permute.xlu1 %907  ;;  %941 = vrot.lane.b32.xlu2 %v2980_v62, %s2682_s29  ;;  %1005 = vmatpush.bf16.msrb.mxu2 %v2980_v62 }
 0x21a   : > { %v910_v63 = vsel %vm288_vm1, %v906_v56, %v908_v61  ;;  %1039 = vrot.lane.b32.xlu0 %v2975_v59, %s2683_s15 }
 0x21b   : > { %918 = vst.msk [vmem:[#allocation2 + $0x28] sm:$0xff] %vm917_vm14, %v910_v63 }
 0x21c   : > { %2410 = vmatmul.msk.bf16.vlgmr.msrb.gmra.mxu2 %vm952_vm15, %v920_v2 }
 0x221   : > { %1037 = vrot.lane.b32.xlu2 %v2980_v62, %s2683_s15 }
 0x222   : > { %v934_v3 = vld [vmem:[#allocation2 + $0x28] sm:$0xff]  ;;  %1095 = vrot.lane.b32.xlu0 %v2975_v59, %s2684_s19 }
 0x223   : > { %v2990_v0 = vpack.c.bf16 %v934_v3, %v2848_v6 }
 0x225   : > { %945 = vrot.lane.b32.xlu1 %v2990_v0, %s2682_s29 }
 0x229   : > { %1093 = vrot.lane.b32.xlu2 %v2980_v62, %s2684_s19 }
 0x22a   : > { %1151 = vrot.lane.b32.xlu0 %v2975_v59, %s2685_s20 }
 0x22d   : > { %1041 = vrot.lane.b32.xlu1 %v2990_v0, %s2683_s15 }
 0x231   : > { %1149 = vrot.lane.b32.xlu2 %v2980_v62, %s2685_s20 }
 0x232   : > { %1207 = vrot.lane.b32.xlu0 %v2975_v59, %s2686_s27 }
 0x235   : > { %1097 = vrot.lane.b32.xlu1 %v2990_v0, %s2684_s19 }
 0x239   : > { %1205 = vrot.lane.b32.xlu2 %v2980_v62, %s2686_s27 }
 0x23a   : > { %1263 = vrot.lane.b32.xlu0 %v2975_v59, %s2687_s30 }
 0x23d   : > { %1153 = vrot.lane.b32.xlu1 %v2990_v0, %s2685_s20 }
 0x241   : > { %1261 = vrot.lane.b32.xlu2 %v2980_v62, %s2687_s30 }
 0x242   : > { %1319 = vrot.lane.b32.xlu0 %v2975_v59, %s2688_s7 }
 0x245   : > { %1209 = vrot.lane.b32.xlu1 %v2990_v0, %s2686_s27 }
 0x249   : > { %1317 = vrot.lane.b32.xlu2 %v2980_v62, %s2688_s7 }
 0x24a   : > { %1375 = vrot.lane.b32.xlu0 %v2975_v59, %s2689_s8 }
 0x24d   : > { %1265 = vrot.lane.b32.xlu1 %v2990_v0, %s2687_s30 }
 0x251   : > { %1373 = vrot.lane.b32.xlu2 %v2980_v62, %s2689_s8 }
 0x255   : > { %1321 = vrot.lane.b32.xlu1 %v2990_v0, %s2688_s7 }
 0x259   : > { %1433 = vperm.xlu2 %2544, %v2434_v55  }
 0x25d   : > { %1377 = vrot.lane.b32.xlu1 %v2990_v0, %s2689_s8 }
 0x273   : > { %v942_v6 = vpop.permute.xlu2 %941 }
 0x27b   : > { %v1038_v4 = vpop.permute.xlu2 %1037 }
 0x283   : > { %v1094_v9 = vpop.permute.xlu2 %1093 }
 0x284   : > { %v944_v1 = vpop.permute.xlu0 %943 }
 0x285   : > { %v947_v5 = vsel %vm330_vm6, %v942_v6, %v944_v1 }
 0x286   : > { %963 = vmatpush.bf16.msra.mxu3 %v947_v5 }
 0x289   : > { %2407 = vmatmul.msk.bf16.vlgmr.msra.gmra.mxu3 %vm952_vm15, %v921_v7 }
 0x28a   : > { %1018 = vmatpush.bf16.msrb.mxu3 %v2975_v59 }
 0x28b   : > { %v1150_v14 = vpop.permute.xlu2 %1149 }
 0x28c   : > { %v1040_v8 = vpop.permute.xlu0 %1039 }
 0x28d   : > { %v1043_v12 = vsel %vm443_vm5, %v1038_v4, %v1040_v8 }
 0x293   : > { %v1206_v21 = vpop.permute.xlu2 %1205 }
 0x294   : > { %v1096_v11 = vpop.permute.xlu0 %1095 }
 0x295   : > { %v1099_v15 = vsel %vm506_vm7, %v1094_v9, %v1096_v11 }
 0x297   : > { %v946_v10 = vpop.permute.xlu1 %945 }
 0x298   : > { %v948_v13 = vsel %vm330_vm6, %v944_v1, %v946_v10  ;;  %989 = vmatpush.bf16.msrb.mxu1 %v946_v10 }
 0x299   : > { %976 = vmatpush.bf16.msrb.mxu0 %v948_v13  ;;  %2411 = vmatmul.msk.bf16.vlgmr.msrb.gmra.mxu3 %vm952_vm15, %v920_v2 }
 0x29b   : > { %2409 = vmatmul.msk.bf16.vlgmr.msrb.gmra.mxu1 %vm952_vm15, %v921_v7  ;;  %v1262_v32 = vpop.permute.xlu2 %1261 }
 0x29c   : > { %1058 = vmatpush.bf16.msra.mxu1 %v1043_v12  ;;  %2408 = vmatmul.msk.bf16.vlgmr.msrb.gmra.mxu0 %vm952_vm15, %v921_v7  ;;  %v1152_v17 = vpop.permute.xlu0 %1151 }
 0x29d   : > { %1031 = vmatpush.bf16.msra.mxu0 %v2990_v0  ;;  %v1155_v19 = vsel %vm569_vm8, %v1150_v14, %v1152_v17 }
 0x29f   : > { %v1042_v16 = vpop.permute.xlu1 %1041  ;;  %v1007_v54 = vpop.f32.mrf.mxu2 }
 0x2a0   : > { %v1044_v18 = vsel %vm443_vm5, %v1040_v8, %v1042_v16  ;;  %1084 = vmatpush.bf16.msra.mxu3 %v1042_v16 }
 0x2a1   : > { %1114 = vmatpush.bf16.msrb.mxu0 %v1099_v15  ;;  %1071 = vmatpush.bf16.msra.mxu2 %v1044_v18 }
 0x2a3   : > { %v1318_v39 = vpop.permute.xlu2 %1317 }
 0x2a4   : > { %1170 = vmatpush.bf16.msrb.mxu3 %v1155_v19  ;;  %2414 = vmatmul.msk.bf16.vlgmr.msra.gmra.mxu2 %vm952_vm15, %v922_v20  ;;  %v1208_v23 = vpop.permute.xlu0 %1207 }
 0x2a5   : > { %v1211_v25 = vsel %vm632_vm9, %v1206_v21, %v1208_v23 }
 0x2a7   : > { %v1098_v22 = vpop.permute.xlu1 %1097  ;;  %v1009_v56 = vpop.f32.mrf.mxu2 }
 0x2a8   : > { %v1100_v24 = vsel %vm506_vm7, %v1096_v11, %v1098_v22  ;;  %1140 = vmatpush.bf16.msrb.mxu2 %v1098_v22 }
 0x2a9   : > { %1127 = vmatpush.bf16.msrb.mxu1 %v1100_v24  ;;  %2415 = vmatmul.msk.bf16.vlgmr.msra.gmra.mxu3 %vm952_vm15, %v922_v20 }
 0x2ab   : > { %2413 = vmatmul.msk.bf16.vlgmr.msra.gmra.mxu1 %vm952_vm15, %v922_v20  ;;  %v1374_v45 = vpop.permute.xlu2 %1373 }
 0x2ac   : > { %1226 = vmatpush.bf16.msra.mxu2 %v1211_v25  ;;  %2412 = vmatmul.msk.bf16.vlgmr.msra.gmra.mxu0 %vm952_vm15, %v920_v2  ;;  %v1264_v29 = vpop.permute.xlu0 %1263 }
 0x2ad   : > { %v1267_v31 = vsel %vm695_vm10, %v1262_v32, %v1264_v29 }
 0x2af   : > { %v1154_v26 = vpop.permute.xlu1 %1153 }
 0x2b0   : > { %v1156_v27 = vsel %vm569_vm8, %v1152_v17, %v1154_v26  ;;  %1196 = vmatpush.bf16.msra.mxu1 %v1154_v26 }
 0x2b1   : > { %1183 = vmatpush.bf16.msra.mxu0 %v1156_v27 }
 0x2b4   : > { %2418 = vmatmul.msk.bf16.vlgmr.msrb.gmra.mxu2 %vm952_vm15, %v923_v28  ;;  %v1320_v36 = vpop.permute.xlu0 %1319 }
 0x2b5   : > { %v1323_v46 = vsel %vm758_vm11, %v1318_v39, %v1320_v36 }
 0x2b7   : > { %v1210_v30 = vpop.permute.xlu1 %1209 }
 0x2b8   : > { %v1212_v33 = vsel %vm632_vm9, %v1208_v23, %v1210_v30 }
 0x2b9   : > { %1239 = vmatpush.bf16.msra.mxu3 %v1212_v33 }
 0x2ba   : > { %2419 = vmatmul.msk.bf16.vlgmr.msrb.gmra.mxu3 %vm952_vm15, %v924_v34 }
 0x2bb   : > { %2417 = vmatmul.msk.bf16.vlgmr.msrb.gmra.mxu1 %vm952_vm15, %v923_v28 }
 0x2bc   : > { %1282 = vmatpush.bf16.msrb.mxu1 %v1267_v31  ;;  %2416 = vmatmul.msk.bf16.vlgmr.msrb.gmra.mxu0 %vm952_vm15, %v923_v28  ;;  %v1376_v43 = vpop.permute.xlu0 %1375 }
 0x2bd   : > { %1252 = vmatpush.bf16.msrb.mxu0 %v1210_v30  ;;  %v1379_v47 = vsel %vm821_vm12, %v1374_v45, %v1376_v43 }
 0x2bf   : > { %v1266_v35 = vpop.permute.xlu1 %1265 }
 0x2c0   : > { %v1268_v37 = vsel %vm695_vm10, %v1264_v29, %v1266_v35  ;;  %1308 = vmatpush.bf16.msrb.mxu3 %v1266_v35 }
 0x2c1   : > { %1295 = vmatpush.bf16.msrb.mxu2 %v1268_v37 }
 0x2c4   : > { %2422 = vmatmul.msk.bf16.vlgmr.msra.gmra.mxu2 %vm952_vm15, %v925_v38 }
 0x2c7   : > { %v1322_v42 = vpop.permute.xlu1 %1321 }
 0x2c8   : > { %1364 = vmatpush.bf16.msra.mxu2 %v1322_v42  ;;  %v1324_v44 = vsel %vm758_vm11, %v1320_v36, %v1322_v42 }
 0x2ca   : > { %2423 = vmatmul.msk.bf16.vlgmr.msra.gmra.mxu3 %vm952_vm15, %v925_v38 }
 0x2cb   : > { %2421 = vmatmul.msk.bf16.vlgmr.msra.gmra.mxu1 %vm952_vm15, %v924_v34  ;;  %1394 = vmatpush.bf16.msra.mxu3 %v1379_v47 }
 0x2cc   : > { %1351 = vmatpush.bf16.msra.mxu1 %v1324_v44  ;;  %2420 = vmatmul.msk.bf16.vlgmr.msra.gmra.mxu0 %vm952_vm15, %v924_v34 }
 0x2cd   : > { %1338 = vmatpush.bf16.msra.mxu0 %v1323_v46 }
 0x2cf   : > { %v1378_v49 = vpop.permute.xlu1 %1377 }
 0x2d0   : > { %v1380_v50 = vsel %vm821_vm12, %v1376_v43, %v1378_v49 }
 0x2d4   : > { %2426 = vmatmul.msk.bf16.vlgmr.msrb.gmra.mxu2 %vm952_vm15, %v926_v48 }
 0x2da   : > { %2427 = vmatmul.msk.bf16.vlgmr.msrb.gmra.mxu3 %vm952_vm15, %v926_v48 }
 0x2db   : > { %2425 = vmatmul.msk.bf16.vlgmr.msrb.gmra.mxu1 %vm952_vm15, %v926_v48 }
 0x2dc   : > { %1420 = vmatpush.bf16.msrb.mxu1 %v1378_v49  ;;  %2424 = vmatmul.msk.bf16.vlgmr.msrb.gmra.mxu0 %vm952_vm15, %v925_v38 }
 0x2dd   : > { %1407 = vmatpush.bf16.msrb.mxu0 %v1380_v50 }
 0x2e4   : > { %2430 = vmatmul.msk.bf16.vlgmr.msra.gmra.mxu2 %vm952_vm15, %v927_v51 }
 0x2ea   : > { %2431 = vmatmul.msk.bf16.vlgmr.msra.gmra.mxu3 %vm952_vm15, %v928_v52 }
 0x2eb   : > { %2429 = vmatmul.msk.bf16.vlgmr.msra.gmra.mxu1 %vm952_vm15, %v927_v51 }
 0x2ec   : > { %2428 = vmatmul.msk.bf16.vlgmr.msra.gmra.mxu0 %vm952_vm15, %v927_v51 }
 0x2fb   : > { %2433 = vmatmul.msk.bf16.vlgmr.msrb.gmra.mxu1 %vm952_vm15, %v928_v52 }
 0x2fc   : > { %2432 = vmatmul.msk.bf16.vlgmr.msrb.gmra.mxu0 %vm952_vm15, %v928_v52 }
 0x30c   : > { %v965_v57 = vpop.f32.mrf.mxu3 }
 0x30d   : > { %v1008_v58 = vadd.f32 %v1007_v54, %v965_v57  ;;  %v1434_v54 = vpop.permute.xlu2 %1433 }
 0x314   : > { %v967_v60 = vpop.f32.mrf.mxu3 }
 0x318   : > { %v991_v61 = vpop.f32.mrf.mxu1 }
 0x319   : > { %v978_v63 = vpop.f32.mrf.mxu0 }
 0x31c   : > { %v1020_v3 = vpop.f32.mrf.mxu3 }
 0x31d   : > { %v1021_v6 = vadd.f32 %v1020_v3, %v978_v63 }
 0x320   : > { %v993_v2 = vpop.f32.mrf.mxu1 }
 0x321   : > { %v980_v1 = vpop.f32.mrf.mxu0 }
 0x324   : > { %v1022_v5 = vpop.f32.mrf.mxu3 }
 0x327   : > { %v1073_v4 = vpop.f32.mrf.mxu2 }
 0x328   : > { %v1060_v7 = vpop.f32.mrf.mxu1  ;;  %v1091_v8 = vadd.f32 %v1073_v4, %v1021_v6 }
 0x329   : > { %v1033_v9 = vpop.f32.mrf.mxu0  ;;  %v1090_v39 = vadd.f32 %v1060_v7, %v1008_v58 }
 0x32a   : > { %v1034_v10 = vadd.f32 %v1033_v9, %v991_v61 }
 0x32c   : > { %v1086_v12 = vpop.f32.mrf.mxu3 }
 0x32d   : > { %v1092_v49 = vadd.f32 %v1086_v12, %v1034_v10 }
 0x32f   : > { %v1075_v11 = vpop.f32.mrf.mxu2 }
 0x330   : > { %v1062_v13 = vpop.f32.mrf.mxu1 }
 0x331   : > { %v1035_v14 = vpop.f32.mrf.mxu0 }
 0x334   : > { %v1088_v16 = vpop.f32.mrf.mxu3 }
 0x337   : > { %v1142_v15 = vpop.f32.mrf.mxu2 }
 0x338   : > { %v1129_v17 = vpop.f32.mrf.mxu1  ;;  %v1148_v51 = vadd.f32 %v1142_v15, %v1092_v49 }
 0x339   : > { %v1116_v18 = vpop.f32.mrf.mxu0  ;;  %v1147_v56 = vadd.f32 %v1129_v17, %v1091_v8 }
 0x33a   : > { %v1146_v42 = vadd.f32 %v1116_v18, %v1090_v39 }
 0x33d   : > { %v1172_v21 = vpop.f32.mrf.mxu3 }
 0x33e   : > { %v1202_v46 = vadd.f32 %v1172_v21, %v1146_v42 }
 0x33f   : > { %v1144_v19 = vpop.f32.mrf.mxu2 }
 0x340   : > { %v1131_v20 = vpop.f32.mrf.mxu1 }
 0x341   : > { %v1118_v22 = vpop.f32.mrf.mxu0 }
 0x345   : > { %v1174_v25 = vpop.f32.mrf.mxu3 }
 0x347   : > { %v1228_v23 = vpop.f32.mrf.mxu2 }
 0x348   : > { %v1198_v24 = vpop.f32.mrf.mxu1  ;;  %v1258_v48 = vadd.f32 %v1228_v23, %v1202_v46  ;;  %v2462_v46 = vld [vmem:[%s3388_s2 + $0x10] sm:$0xff] }
 0x349   : > { %v1185_v26 = vpop.f32.mrf.mxu0  ;;  %v1204_v61 = vadd.f32 %v1198_v24, %v1148_v51 }
 0x34a   : > { %v1203_v58 = vadd.f32 %v1185_v26, %v1147_v56 }
 0x34d   : > { %v1241_v29 = vpop.f32.mrf.mxu3 }
 0x34e   : > { %v1259_v1 = vadd.f32 %v1241_v29, %v1203_v58 }
 0x34f   : > { %v1230_v27 = vpop.f32.mrf.mxu2 }
 0x350   : > { %v1200_v28 = vpop.f32.mrf.mxu1 }
 0x351   : > { %v1187_v30 = vpop.f32.mrf.mxu0 }
 0x355   : > { %v1243_v34 = vpop.f32.mrf.mxu3 }
 0x357   : > { %v1297_v32 = vpop.f32.mrf.mxu2 }
 0x358   : > { %v1284_v33 = vpop.f32.mrf.mxu1  ;;  %v1315_v7 = vadd.f32 %v1297_v32, %v1259_v1 }
 0x359   : > { %v1254_v31 = vpop.f32.mrf.mxu0  ;;  %v1314_v50 = vadd.f32 %v1284_v33, %v1258_v48 }
 0x35a   : > { %v1260_v2 = vadd.f32 %v1254_v31, %v1204_v61 }
 0x35d   : > { %v1310_v37 = vpop.f32.mrf.mxu3 }
 0x35e   : > { %v1316_v4 = vadd.f32 %v1310_v37, %v1260_v2 }
 0x35f   : > { %v1299_v35 = vpop.f32.mrf.mxu2 }
 0x360   : > { %v1286_v36 = vpop.f32.mrf.mxu1 }
 0x361   : > { %v1256_v38 = vpop.f32.mrf.mxu0 }
 0x365   : > { %v1312_v45 = vpop.f32.mrf.mxu3 }
 0x367   : > { %v1366_v43 = vpop.f32.mrf.mxu2 }
 0x368   : > { %v1353_v44 = vpop.f32.mrf.mxu1  ;;  %v1372_v9 = vadd.f32 %v1366_v43, %v1316_v4 }
 0x369   : > { %v1340_v47 = vpop.f32.mrf.mxu0  ;;  %v1371_v11 = vadd.f32 %v1353_v44, %v1315_v7  ;;  %v1463_v44 = vld [vmem:[#allocation6 + $0x48] sm:$0xf] }
 0x36a   : > { %v1370_v52 = vadd.f32 %v1340_v47, %v1314_v50  ;;  %v1464_v47 = vld [vmem:[#allocation6 + $0x4c] sm:$0xf] }
 0x36d   : > { %v1396_v60 = vpop.f32.mrf.mxu3 }
 0x36e   : > { %v1426_v3 = vadd.f32 %v1396_v60, %v1370_v52 }
 0x36f   : > { %v1368_v55 = vpop.f32.mrf.mxu2 }
 0x370   : > { %v1355_v57 = vpop.f32.mrf.mxu1  ;;  %v1436_v6 = vadd.f32 %v1434_v54, %v1426_v3 }
 0x371   : > { %v1342_v63 = vpop.f32.mrf.mxu0 }
 0x372   : > { %v1439_v5 = vmax.f32 %v1436_v6, 0.0 }
 0x374   : > { %v1442_v10 = vmul.f32 %v1439_v5, %v2962_v41 }
 0x375   : > { %v1398_v13 = vpop.f32.mrf.mxu3 }
 0x376   : > { %1448 = vrot.lane.b32.xlu0 %v1442_v10, %s2691_s26 }
 0x378   : > { %v1422_v12 = vpop.f32.mrf.mxu1 }
 0x379   : > { %v1428_v14 = vadd.f32 %v1422_v12, %v1372_v9  ;;  %v1409_v8 = vpop.f32.mrf.mxu0 }
 0x37a   : > { %v1427_v15 = vadd.f32 %v1409_v8, %v1371_v11 }
 0x37b   : > { %v1438_v16 = vadd.f32 %v1434_v54, %v1428_v14 }
 0x37c   : > { %v1437_v17 = vadd.f32 %v1434_v54, %v1427_v15 }
 0x37d   : > { %v1441_v18 = vmax.f32 %v1438_v16, 0.0 }
 0x37e   : > { %v1440_v19 = vmax.f32 %v1437_v17, 0.0  ;;  %1493 = vrot.lane.b32.xlu0 %v2980_v62, %s2682_s29 }
 0x37f   : > { %v1444_v20 = vmul.f32 %v1441_v18, %v2968_v53 }
 0x380   : > { %v1443_v21 = vmul.f32 %v1440_v19, %v2960_v40  ;;  %v1424_v22 = vpop.f32.mrf.mxu1 }
 0x381   : > { %1452 = vrot.lane.b32.xlu2 %v1444_v20, %s2691_s26  ;;  %v1411_v23 = vpop.f32.mrf.mxu0 }
 0x382   : > { %1450 = vrot.lane.b32.xlu1 %v1443_v21, %s2691_s26  ;;  %v1465_v21 = vld [vmem:[#allocation6 + $0x50] sm:$0xf] }
 0x386   : > { %1617 = vrot.lane.b32.xlu0 %v2975_v59, %s2683_s15 }
 0x389   : > { %1497 = vrot.lane.b32.xlu2 %v2990_v0, %s2682_s29 }
 0x38a   : > { %1495 = vrot.lane.b32.xlu1 %v2975_v59, %s2682_s29 }
 0x391   : > { %1615 = vrot.lane.b32.xlu2 %v2980_v62, %s2683_s15 }
 0x3db   : > { %v1453_v26 = vpop.permute.xlu2 %1452 }
 0x3e3   : > { %v1498_v35 = vpop.permute.xlu2 %1497 }
 0x3e8   : > { %v1449_v24 = vpop.permute.xlu0 %1448 }
 0x3e9   : > { %1459 = vst.msk [vmem:[#allocation2 + $0x30] sm:$0xff] %vm914_vm13, %v1449_v24 }
 0x3eb   : > { %v3183_v36 = vpop.permute.xlu2 %1615 }
 0x3f0   : > { %v3099_v25 = vld [vmem:[#allocation2 + $0x30] sm:$0xff]  ;;  %v1494_v37 = vpop.permute.xlu0 %1493 }
 0x3f1   : > { %v1484_v27 = vpack.c.bf16 %v3099_v25, %v3099_v25 }
 0x3f3   : > { %1499 = vrot.lane.b32.xlu0 %v1484_v27, %s2682_s29  ;;  %1694 = vrot.lane.b32.xlu1 %v1484_v27, %s2684_s19  ;;  %v1568_v32 = vsel %vm337_vm3, %v1484_v27, 0 }
 0x3f4   : > { %v1451_v28 = vpop.permute.xlu1 %1450  ;;  %1582 = vmatpush.bf16.msra.mxu1 %v1568_v32 }
 0x3f5   : > { %v3104_v29 = vsel %vm288_vm1, %v1449_v24, %v1451_v28  ;;  %v1455_v30 = vsel %vm288_vm1, %v1451_v28, %v1453_v26  ;;  %v1466_v28 = vld [vmem:[#allocation6 + $0x54] sm:$0xf] }
 0x3f6   : > { %1461 = vst.msk [vmem:[#allocation2 + $0x40] sm:$0xff] %vm917_vm14, %v1455_v30  ;;  %v3114_v33 = vpack.c.bf16 %v3104_v29, %v3104_v29 }
 0x3f8   : > { %1583 = vmatpush.bf16.msra.mxu1 %v2980_v62  ;;  %v3195_v43 = vpop.permute.xlu0 %1617  ;;  %v1571_v63 = vsel %vm337_vm3, %v3114_v33, 0 }
 0x3f9   : > { %v1627_v17 = vsel %vm443_vm5, %v3183_v36, %v3195_v43 }
 0x3fb   : > { %1621 = vrot.lane.b32.xlu0 %v1484_v27, %s2683_s15  ;;  %1501 = vrot.lane.b32.xlu1 %v3114_v33, %s2682_s29 }
 0x3fc   : > { %v1496_v42 = vpop.permute.xlu1 %1495  ;;  %2438 = vmatmul.msk.bf16.vlgmr.msra.gmra.mxu1 %vm1512_vm0, %v1463_v44 }
 0x3fd   : > { %v3116_v34 = vld [vmem:[#allocation2 + $0x40] sm:$0xff]  ;;  %v1505_v60 = vsel %vm330_vm6, %v1494_v37, %v1496_v42  ;;  %v1506_v61 = vsel %vm330_vm6, %v1496_v42, %v1498_v35 }
 0x3fe   : > { %v3123_v31 = vpack.c.bf16 %v3116_v34, %v3116_v34 }
 0x400   : > { %1503 = vrot.lane.b32.xlu2 %v3123_v31, %s2682_s29  ;;  %v1574_v3 = vsel %vm337_vm3, %v3123_v31, 0 }
 0x403   : > { %1625 = vrot.lane.b32.xlu0 %v3123_v31, %s2683_s15  ;;  %1688 = vrot.lane.b32.xlu1 %v2980_v62, %s2684_s19 }
 0x408   : > { %1690 = vrot.lane.b32.xlu2 %v2975_v59, %s2684_s19 }
 0x40b   : > { %1619 = vrot.lane.b32.xlu0 %v2990_v0, %s2683_s15  ;;  %1698 = vrot.lane.b32.xlu1 %v3123_v31, %s2684_s19 }
 0x410   : > { %1692 = vrot.lane.b32.xlu2 %v2990_v0, %s2684_s19 }
 0x413   : > { %1767 = vrot.lane.b32.xlu0 %v1484_v27, %s2685_s20  ;;  %1623 = vrot.lane.b32.xlu1 %v3114_v33, %s2683_s15 }
 0x418   : > { %1771 = vrot.lane.b32.xlu2 %v3123_v31, %s2685_s20 }
 0x41b   : > { %1761 = vrot.lane.b32.xlu0 %v2980_v62, %s2685_s20  ;;  %1763 = vrot.lane.b32.xlu1 %v2975_v59, %s2685_s20 }
 0x420   : > { %1696 = vrot.lane.b32.xlu2 %v3114_v33, %s2684_s19 }
 0x423   : > { %1836 = vrot.lane.b32.xlu0 %v2975_v59, %s2686_s27  ;;  %1844 = vrot.lane.b32.xlu1 %v3123_v31, %s2686_s27 }
 0x428   : > { %1765 = vrot.lane.b32.xlu2 %v2990_v0, %s2685_s20 }
 0x42b   : > { %1909 = vrot.lane.b32.xlu0 %v2975_v59, %s2687_s30  ;;  %1769 = vrot.lane.b32.xlu1 %v3114_v33, %s2685_s20 }
 0x430   : > { %1840 = vrot.lane.b32.xlu2 %v1484_v27, %s2686_s27 }
 0x433   : > { %1842 = vrot.lane.b32.xlu0 %v3114_v33, %s2686_s27  ;;  %1838 = vrot.lane.b32.xlu1 %v2990_v0, %s2686_s27 }
 0x438   : > { %1913 = vrot.lane.b32.xlu2 %v1484_v27, %s2687_s30 }
 0x43b   : > { %1915 = vrot.lane.b32.xlu0 %v3114_v33, %s2687_s30  ;;  %1834 = vrot.lane.b32.xlu1 %v2980_v62, %s2686_s27 }
 0x440   : > { %1907 = vrot.lane.b32.xlu2 %v2980_v62, %s2687_s30 }
 0x443   : > { %1917 = vrot.lane.b32.xlu0 %v3123_v31, %s2687_s30  ;;  %1986 = vrot.lane.b32.xlu1 %v1484_v27, %s2688_s7 }
 0x448   : > { %1982 = vrot.lane.b32.xlu2 %v2975_v59, %s2688_s7 }
 0x44b   : > { %1911 = vrot.lane.b32.xlu0 %v2990_v0, %s2687_s30  ;;  %1980 = vrot.lane.b32.xlu1 %v2980_v62, %s2688_s7 }
 0x450   : > { %1988 = vrot.lane.b32.xlu2 %v3114_v33, %s2688_s7 }
 0x453   : > { %2059 = vrot.lane.b32.xlu0 %v1484_v27, %s2689_s8  ;;  %1990 = vrot.lane.b32.xlu1 %v3123_v31, %s2688_s7 }
 0x458   : > { %1984 = vrot.lane.b32.xlu2 %v2990_v0, %s2688_s7  ;;  %s286_s7 = scalar_lea.vmem [#allocation8], %s2471_s1 }
 0x459   : > { %s2290_s12 = sshll.u32 %s286_s7, 4  ;;  %s2291_s12 = int_to_ptr.vmem [resolvable:$true] %s2290_s12 }
 0x45a   : > { %v1504_v38 = vpop.permute.xlu2 %1503 }
 0x45b   : > { %v1523_v39 = vsel %vm337_vm3, %v1504_v38, 0  ;;  %2053 = vrot.lane.b32.xlu0 %v2980_v62, %s2689_s8  ;;  %2061 = vrot.lane.b32.xlu1 %v3114_v33, %s2689_s8 }
 0x45c   : > { %1557 = vmatpush.bf16.msra.mxu0 %v1523_v39 }
 0x460   : > { %1558 = vmatpush.bf16.msra.mxu0 %v1498_v35  ;;  %2063 = vrot.lane.b32.xlu2 %v3123_v31, %s2689_s8 }
 0x462   : > { %v3199_v45 = vpop.permute.xlu2 %1690 }
 0x463   : > { %2437 = vmatmul.msk.bf16.vlgmr.msra.gmra.mxu0 %vm1512_vm0, %v1464_v47  ;;  %2130 = vperm.xlu0 %2543, %v2462_v46  }
 0x464   : > { %2055 = vrot.lane.b32.xlu1 %v2975_v59, %s2689_s8 }
 0x465   : > { %v1500_v62 = vpop.permute.xlu0 %1499  ;;  %v1695_v48 = vpop.permute.xlu1 %1694 }
 0x468   : > { %2057 = vrot.lane.b32.xlu2 %v2990_v0, %s2689_s8 }
 0x46a   : > { %v3210_v49 = vpop.permute.xlu2 %1692 }
 0x46b   : > { %v1701_v24 = vsel %vm506_vm7, %v3199_v45, %v3210_v49 }
 0x46d   : > { %v1622_v50 = vpop.permute.xlu0 %1621  ;;  %v1502_v51 = vpop.permute.xlu1 %1501 }
 0x46e   : > { %v1507_v52 = vsel %vm330_vm6, %v1500_v62, %v1502_v51  ;;  %v1508_v54 = vsel %vm330_vm6, %v1502_v51, %v1504_v38 }
 0x46f   : > { %v1517_v55 = vsel %vm337_vm3, %v1507_v52, 0  ;;  %v1520_v56 = vsel %vm337_vm3, %v1508_v54, 0 }
 0x470   : > { %1531 = vmatpush.bf16.msrb.mxu2 %v1517_v55  ;;  %1544 = vmatpush.bf16.msrb.mxu3 %v1520_v56 }
 0x472   : > { %v3216_v57 = vpop.permute.xlu2 %1771 }
 0x473   : > { %v1790_v26 = vsel %vm337_vm3, %v3216_v57, 0 }
 0x474   : > { %1532 = vmatpush.bf16.msrb.mxu2 %v1505_v60  ;;  %1545 = vmatpush.bf16.msrb.mxu3 %v1506_v61  ;;  %v1468_v61 = vld [vmem:[#allocation6 + $0x5c] sm:$0xf] }
 0x475   : > { %v1626_v58 = vpop.permute.xlu0 %1625  ;;  %v1689_v2 = vpop.permute.xlu1 %1688 }
 0x476   : > { %v1644_v4 = vsel %vm337_vm3, %v1626_v58, 0  ;;  %v1700_v10 = vsel %vm506_vm7, %v1689_v2, %v3199_v45  ;;  %v1467_v45 = vld [vmem:[#allocation6 + $0x58] sm:$0xf] }
 0x477   : > { %2435 = vmatmul.msk.bf16.vlgmr.msrb.gmra.mxu2 %vm1512_vm0, %v1464_v47  ;;  %2436 = vmatmul.msk.bf16.vlgmr.msrb.gmra.mxu3 %vm1512_vm0, %v1464_v47 }
 0x478   : > { %1595 = vmatpush.bf16.msra.mxu2 %v1571_v63  ;;  %1608 = vmatpush.bf16.msra.mxu3 %v1574_v3 }
 0x47a   : > { %v1697_v6 = vpop.permute.xlu2 %1696 }
 0x47b   : > { %v1702_v1 = vsel %vm506_vm7, %v1695_v48, %v1697_v6 }
 0x47c   : > { %1596 = vmatpush.bf16.msra.mxu2 %v2975_v59  ;;  %1609 = vmatpush.bf16.msra.mxu3 %v2990_v0  ;;  %v1711_v5 = vsel %vm337_vm3, %v1702_v1, 0 }
 0x47d   : > { %v1620_v7 = vpop.permute.xlu0 %1619  ;;  %v1699_v9 = vpop.permute.xlu1 %1698 }
 0x47e   : > { %v1703_v15 = vsel %vm506_vm7, %v1697_v6, %v1699_v9  ;;  %v1628_v18 = vsel %vm443_vm5, %v3195_v43, %v1620_v7  ;;  %v1717_v20 = vsel %vm337_vm3, %v1699_v9, 0 }
 0x47f   : > { %v1714_v19 = vsel %vm337_vm3, %v1703_v15, 0 }
 0x480   : > { %1678 = vmatpush.bf16.msrb.mxu2 %v1644_v4  ;;  %1725 = vmatpush.bf16.msrb.mxu3 %v1711_v5 }
 0x482   : > { %v1766_v11 = vpop.permute.xlu2 %1765 }
 0x484   : > { %1679 = vmatpush.bf16.msrb.mxu2 %v1620_v7  ;;  %1726 = vmatpush.bf16.msrb.mxu3 %v1700_v10  ;;  %v1469_v10 = vld [vmem:[#allocation6 + $0x60] sm:$0xf] }
 0x485   : > { %v1768_v12 = vpop.permute.xlu0 %1767  ;;  %v1624_v13 = vpop.permute.xlu1 %1623 }
 0x486   : > { %v1629_v14 = vsel %vm443_vm5, %v1622_v50, %v1624_v13  ;;  %v1630_v59 = vsel %vm443_vm5, %v1624_v13, %v1626_v58 }
 0x487   : > { %v1638_v0 = vsel %vm337_vm3, %v1629_v14, 0  ;;  %v1641_v8 = vsel %vm337_vm3, %v1630_v59, 0  ;;  %2439 = vmatmul.msk.bf16.vlgmr.msra.gmra.mxu2 %vm1512_vm0, %v1463_v44  ;;  %2440 = vmatmul.msk.bf16.vlgmr.msra.gmra.mxu3 %vm1512_vm0, %v1463_v44  ;;  %v1470_v59 = vld [vmem:[#allocation6 + $0x64] sm:$0xf] }
 0x488   : > { %1652 = vmatpush.bf16.msrb.mxu0 %v1638_v0  ;;  %1665 = vmatpush.bf16.msrb.mxu1 %v1641_v8 }
 0x48a   : > { %v1841_v16 = vpop.permute.xlu2 %1840 }
 0x48c   : > { %1653 = vmatpush.bf16.msrb.mxu0 %v1627_v17  ;;  %1666 = vmatpush.bf16.msrb.mxu1 %v1628_v18 }
 0x48d   : > { %v1762_v22 = vpop.permute.xlu0 %1761  ;;  %v1764_v23 = vpop.permute.xlu1 %1763 }
 0x48e   : > { %v1773_v42 = vsel %vm569_vm8, %v1762_v22, %v1764_v23  ;;  %v1774_v43 = vsel %vm569_vm8, %v1764_v23, %v1766_v11 }
 0x48f   : > { %2441 = vmatmul.msk.bf16.vlgmr.msrb.gmra.mxu0 %vm1512_vm0, %v1465_v21  ;;  %2442 = vmatmul.msk.bf16.vlgmr.msrb.gmra.mxu1 %vm1512_vm0, %v1465_v21 }
 0x490   : > { %1738 = vmatpush.bf16.msra.mxu0 %v1714_v19  ;;  %1751 = vmatpush.bf16.msra.mxu1 %v1717_v20 }
 0x492   : > { %v1914_v27 = vpop.permute.xlu2 %1913 }
 0x494   : > { %1739 = vmatpush.bf16.msra.mxu0 %v1701_v24  ;;  %1752 = vmatpush.bf16.msra.mxu1 %v3210_v49 }
 0x495   : > { %v1837_v30 = vpop.permute.xlu0 %1836  ;;  %v1845_v32 = vpop.permute.xlu1 %1844 }
 0x496   : > { %v1863_v44 = vsel %vm337_vm3, %v1845_v32, 0 }
 0x497   : > { %2443 = vmatmul.msk.bf16.vlgmr.msrb.gmra.mxu2 %vm1512_vm0, %v1465_v21  ;;  %2444 = vmatmul.msk.bf16.vlgmr.msrb.gmra.mxu3 %vm1512_vm0, %v1466_v28 }
 0x498   : > { %1824 = vmatpush.bf16.msrb.mxu0 %v1790_v26 }
 0x49a   : > { %v1908_v35 = vpop.permute.xlu2 %1907 }
 0x49c   : > { %1825 = vmatpush.bf16.msrb.mxu0 %v1766_v11 }
 0x49d   : > { %v3257_v33 = vpop.permute.xlu0 %1909  ;;  %v1770_v31 = vpop.permute.xlu1 %1769 }
 0x49e   : > { %v1775_v36 = vsel %vm569_vm8, %v1768_v12, %v1770_v31  ;;  %v1776_v37 = vsel %vm569_vm8, %v1770_v31, %v3216_v57  ;;  %v1919_v3 = vsel %vm695_vm10, %v1908_v35, %v3257_v33  ;;  %v1471_v31 = vld [vmem:[#allocation6 + $0x68] sm:$0xf]  ;;  %v1585_v35 = vpop.f32.mrf.mxu1 }
 0x49f   : > { %v1784_v38 = vsel %vm337_vm3, %v1775_v36, 0  ;;  %v1787_v39 = vsel %vm337_vm3, %v1776_v37, 0  ;;  %2445 = vmatmul.msk.bf16.vlgmr.msra.gmra.mxu0 %vm1512_vm0, %v1466_v28  ;;  %2446 = vmatmul.msk.bf16.vlgmr.msra.gmra.mxu1 %vm1512_vm0, %v1466_v28 }
 0x4a0   : > { %1798 = vmatpush.bf16.msra.mxu2 %v1784_v38  ;;  %1811 = vmatpush.bf16.msra.mxu3 %v1787_v39 }
 0x4a2   : > { %v1983_v51 = vpop.permute.xlu2 %1982 }
 0x4a4   : > { %1799 = vmatpush.bf16.msra.mxu2 %v1773_v42  ;;  %1812 = vmatpush.bf16.msra.mxu3 %v1774_v43 }
 0x4a5   : > { %v1843_v46 = vpop.permute.xlu0 %1842  ;;  %v1839_v47 = vpop.permute.xlu1 %1838 }
 0x4a6   : > { %v1848_v62 = vsel %vm632_vm9, %v1841_v16, %v1843_v46  ;;  %v1849_v48 = vsel %vm632_vm9, %v1843_v46, %v1845_v32  ;;  %v1847_v52 = vsel %vm632_vm9, %v1837_v30, %v1839_v47  ;;  %v1587_v37 = vpop.f32.mrf.mxu1 }
 0x4a7   : > { %v1857_v49 = vsel %vm337_vm3, %v1848_v62, 0  ;;  %v1860_v50 = vsel %vm337_vm3, %v1849_v48, 0  ;;  %2447 = vmatmul.msk.bf16.vlgmr.msra.gmra.mxu2 %vm1512_vm0, %v1467_v45  ;;  %2448 = vmatmul.msk.bf16.vlgmr.msra.gmra.mxu3 %vm1512_vm0, %v1467_v45 }
 0x4a8   : > { %1897 = vmatpush.bf16.msrb.mxu3 %v1863_v44  ;;  %1871 = vmatpush.bf16.msrb.mxu1 %v1857_v49 }
 0x4a9   : > { %1884 = vmatpush.bf16.msrb.mxu2 %v1860_v50 }
 0x4aa   : > { %v1989_v63 = vpop.permute.xlu2 %1988 }
 0x4ac   : > { %1898 = vmatpush.bf16.msrb.mxu3 %v1839_v47 }
 0x4ad   : > { %1885 = vmatpush.bf16.msrb.mxu2 %v1847_v52  ;;  %v1916_v54 = vpop.permute.xlu0 %1915  ;;  %v1835_v55 = vpop.permute.xlu1 %1834 }
 0x4ae   : > { %v1921_v56 = vsel %vm695_vm10, %v1914_v27, %v1916_v54  ;;  %v1846_v57 = vsel %vm632_vm9, %v1835_v55, %v1837_v30 }
 0x4af   : > { %v1930_v60 = vsel %vm337_vm3, %v1921_v56, 0  ;;  %2449 = vmatmul.msk.bf16.vlgmr.msrb.gmra.mxu0 %vm1512_vm0, %v1467_v45  ;;  %1872 = vmatpush.bf16.msrb.mxu1 %v1846_v57 }
 0x4b0   : > { %1944 = vmatpush.bf16.msra.mxu0 %v1930_v60 }
 0x4b2   : > { %2450 = vmatmul.msk.bf16.vlgmr.msrb.gmra.mxu1 %vm1512_vm0, %v1468_v61  ;;  %v1985_v9 = vpop.permute.xlu2 %1984 }
 0x4b3   : > { %v1993_v19 = vsel %vm758_vm11, %v1983_v51, %v1985_v9 }
 0x4b4   : > { %1945 = vmatpush.bf16.msra.mxu0 %v1919_v3 }
 0x4b5   : > { %v1918_v58 = vpop.permute.xlu0 %1917  ;;  %v1987_v2 = vpop.permute.xlu1 %1986 }
 0x4b6   : > { %v1922_v6 = vsel %vm695_vm10, %v1916_v54, %v1918_v58  ;;  %v1936_v1 = vsel %vm337_vm3, %v1918_v58, 0  ;;  %v1994_v4 = vsel %vm758_vm11, %v1987_v2, %v1989_v63 }
 0x4b7   : > { %v1933_v5 = vsel %vm337_vm3, %v1922_v6, 0  ;;  %v2003_v7 = vsel %vm337_vm3, %v1994_v4, 0  ;;  %2451 = vmatmul.msk.bf16.vlgmr.msrb.gmra.mxu2 %vm1512_vm0, %v1468_v61  ;;  %2452 = vmatmul.msk.bf16.vlgmr.msrb.gmra.mxu3 %vm1512_vm0, %v1468_v61 }
 0x4b8   : > { %1970 = vmatpush.bf16.msra.mxu2 %v1936_v1  ;;  %1957 = vmatpush.bf16.msra.mxu1 %v1933_v5 }
 0x4b9   : > { %2017 = vmatpush.bf16.msra.mxu3 %v2003_v7 }
 0x4ba   : > { %v2064_v8 = vpop.permute.xlu2 %2063 }
 0x4bb   : > { %v2082_v20 = vsel %vm337_vm3, %v2064_v8, 0 }
 0x4bd   : > { %v1912_v11 = vpop.permute.xlu0 %1911  ;;  %v1981_v12 = vpop.permute.xlu1 %1980 }
 0x4be   : > { %1971 = vmatpush.bf16.msra.mxu2 %v1912_v11  ;;  %v1920_v13 = vsel %vm695_vm10, %v3257_v33, %v1912_v11  ;;  %v1992_v14 = vsel %vm758_vm11, %v1981_v12, %v1983_v51 }
 0x4bf   : > { %2453 = vmatmul.msk.bf16.vlgmr.msra.gmra.mxu0 %vm1512_vm0, %v1469_v10  ;;  %1958 = vmatpush.bf16.msra.mxu1 %v1920_v13 }
 0x4c0   : > { %2018 = vmatpush.bf16.msra.mxu3 %v1992_v14 }
 0x4c2   : > { %2454 = vmatmul.msk.bf16.vlgmr.msra.gmra.mxu1 %vm1512_vm0, %v1469_v10  ;;  %v2058_v27 = vpop.permute.xlu2 %2057 }
 0x4c5   : > { %v1991_v0 = vpop.permute.xlu1 %1990  ;;  %v2060_v18 = vpop.permute.xlu0 %2059 }
 0x4c6   : > { %v1995_v15 = vsel %vm758_vm11, %v1989_v63, %v1991_v0  ;;  %v2009_v16 = vsel %vm337_vm3, %v1991_v0, 0 }
 0x4c7   : > { %v2006_v17 = vsel %vm337_vm3, %v1995_v15, 0  ;;  %2455 = vmatmul.msk.bf16.vlgmr.msra.gmra.mxu2 %vm1512_vm0, %v1469_v10  ;;  %2456 = vmatmul.msk.bf16.vlgmr.msra.gmra.mxu3 %vm1512_vm0, %v1470_v59 }
 0x4c8   : > { %2043 = vmatpush.bf16.msrb.mxu1 %v2009_v16  ;;  %2030 = vmatpush.bf16.msrb.mxu0 %v2006_v17 }
 0x4cc   : > { %2044 = vmatpush.bf16.msrb.mxu1 %v1985_v9  ;;  %2031 = vmatpush.bf16.msrb.mxu0 %v1993_v19 }
 0x4cd   : > { %v2062_v21 = vpop.permute.xlu1 %2061  ;;  %v2054_v28 = vpop.permute.xlu0 %2053 }
 0x4ce   : > { %v2067_v22 = vsel %vm821_vm12, %v2060_v18, %v2062_v21  ;;  %v2068_v23 = vsel %vm821_vm12, %v2062_v21, %v2064_v8 }
 0x4cf   : > { %v2076_v24 = vsel %vm337_vm3, %v2067_v22, 0  ;;  %v2079_v26 = vsel %vm337_vm3, %v2068_v23, 0  ;;  %2457 = vmatmul.msk.bf16.vlgmr.msrb.gmra.mxu0 %vm1512_vm0, %v1470_v59 }
 0x4d0   : > { %2116 = vmatpush.bf16.msra.mxu0 %v2082_v20  ;;  %2090 = vmatpush.bf16.msrb.mxu2 %v2076_v24 }
 0x4d1   : > { %2103 = vmatpush.bf16.msrb.mxu3 %v2079_v26 }
 0x4d2   : > { %2458 = vmatmul.msk.bf16.vlgmr.msrb.gmra.mxu1 %vm1512_vm0, %v1470_v59 }
 0x4d4   : > { %2117 = vmatpush.bf16.msra.mxu0 %v2058_v27 }
 0x4d6   : > { %v2056_v30 = vpop.permute.xlu1 %2055 }
 0x4d7   : > { %v2065_v32 = vsel %vm821_vm12, %v2054_v28, %v2056_v30  ;;  %v2066_v33 = vsel %vm821_vm12, %v2056_v30, %v2058_v27 }
 0x4d8   : > { %2091 = vmatpush.bf16.msrb.mxu2 %v2065_v32  ;;  %2104 = vmatpush.bf16.msrb.mxu3 %v2066_v33 }
 0x4db   : > { %2459 = vmatmul.msk.bf16.vlgmr.msrb.gmra.mxu2 %vm1512_vm0, %v1471_v31  ;;  %2460 = vmatmul.msk.bf16.vlgmr.msrb.gmra.mxu3 %vm1512_vm0, %v1471_v31 }
 0x4df   : > { %2461 = vmatmul.msk.bf16.vlgmr.msra.gmra.mxu0 %vm1512_vm0, %v1471_v31 }
 0x4e0   : > { %v1560_v36 = vpop.f32.mrf.mxu0 }
 0x4e8   : > { %v1562_v38 = vpop.f32.mrf.mxu0 }
 0x4fa   : > { %v1534_v39 = vpop.f32.mrf.mxu2  ;;  %v1547_v42 = vpop.f32.mrf.mxu3 }
 0x4fb   : > { %v1586_v43 = vadd.f32 %v1585_v35, %v1534_v39 }
 0x502   : > { %v1536_v44 = vpop.f32.mrf.mxu2  ;;  %v1549_v45 = vpop.f32.mrf.mxu3 }
 0x50a   : > { %v1598_v46 = vpop.f32.mrf.mxu2  ;;  %v1611_v47 = vpop.f32.mrf.mxu3 }
 0x50b   : > { %v1599_v62 = vadd.f32 %v1598_v46, %v1547_v42  ;;  %v1612_v48 = vadd.f32 %v1611_v47, %v1560_v36 }
 0x50c   : > { %v1655_v49 = vpop.f32.mrf.mxu0  ;;  %v1668_v50 = vpop.f32.mrf.mxu1 }
 0x50d   : > { %v1685_v51 = vadd.f32 %v1655_v49, %v1586_v43  ;;  %v1686_v52 = vadd.f32 %v1668_v50, %v1599_v62 }
 0x512   : > { %v1600_v54 = vpop.f32.mrf.mxu2  ;;  %v1613_v55 = vpop.f32.mrf.mxu3 }
 0x514   : > { %v1657_v56 = vpop.f32.mrf.mxu0  ;;  %v1670_v57 = vpop.f32.mrf.mxu1 }
 0x51a   : > { %v1681_v60 = vpop.f32.mrf.mxu2  ;;  %v1728_v61 = vpop.f32.mrf.mxu3 }
 0x51b   : > { %v1687_v22 = vadd.f32 %v1681_v60, %v1612_v48  ;;  %v1758_v28 = vadd.f32 %v1728_v61, %v1685_v51  ;;  %v2131_v51 = vpop.permute.xlu0 %2130 }
 0x51c   : > { %v1741_v63 = vpop.f32.mrf.mxu0  ;;  %v1754_v3 = vpop.f32.mrf.mxu1 }
 0x51d   : > { %v1760_v27 = vadd.f32 %v1754_v3, %v1687_v22  ;;  %v1759_v30 = vadd.f32 %v1741_v63, %v1686_v52 }
 0x522   : > { %v1683_v58 = vpop.f32.mrf.mxu2  ;;  %v1730_v2 = vpop.f32.mrf.mxu3 }
 0x524   : > { %v1743_v6 = vpop.f32.mrf.mxu0  ;;  %v1756_v1 = vpop.f32.mrf.mxu1 }
 0x52a   : > { %v1801_v4 = vpop.f32.mrf.mxu2  ;;  %v1814_v5 = vpop.f32.mrf.mxu3 }
 0x52b   : > { %v1831_v31 = vadd.f32 %v1801_v4, %v1758_v28  ;;  %v1832_v35 = vadd.f32 %v1814_v5, %v1759_v30  ;;  %v2160_v5 = vld [vmem:[#allocation2 + $0x8] sm:$0xff] }
 0x52c   : > { %v1827_v7 = vpop.f32.mrf.mxu0 }
 0x52d   : > { %v1833_v33 = vadd.f32 %v1827_v7, %v1760_v27  ;;  %v2163_v7 = vld [vmem:[#allocation2 + $0x20] sm:$0xff] }
 0x52e   : > { %v2171_v27 = vld [vmem:[%s3389_s3] sm:$0xf] }
 0x52f   : > { %v1874_v9 = vpop.f32.mrf.mxu1 }
 0x530   : > { %v1904_v38 = vadd.f32 %v1874_v9, %v1831_v31  ;;  %v2173_v9 = vpack.c.bf16 %v2163_v7, %v2160_v5 }
 0x532   : > { %v1803_v10 = vpop.f32.mrf.mxu2  ;;  %v1816_v11 = vpop.f32.mrf.mxu3 }
 0x533   : > { %v2159_v10 = vld [vmem:[#allocation2] sm:$0xff] }
 0x534   : > { %v1829_v12 = vpop.f32.mrf.mxu0 }
 0x537   : > { %v1876_v13 = vpop.f32.mrf.mxu1 }
 0x53a   : > { %v1887_v14 = vpop.f32.mrf.mxu2  ;;  %v1900_v59 = vpop.f32.mrf.mxu3 }
 0x53b   : > { %v1906_v36 = vadd.f32 %v1900_v59, %v1833_v33  ;;  %v1905_v39 = vadd.f32 %v1887_v14, %v1832_v35 }
 0x53c   : > { %v1947_v0 = vpop.f32.mrf.mxu0 }
 0x53d   : > { %v1977_v43 = vadd.f32 %v1947_v0, %v1904_v38  ;;  %v2161_v0 = vld [vmem:[#allocation2 + $0x10] sm:$0xff] }
 0x53f   : > { %v1960_v8 = vpop.f32.mrf.mxu1 }
 0x540   : > { %v1978_v44 = vadd.f32 %v1960_v8, %v1905_v39  ;;  %v2164_v8 = vld [vmem:[#allocation2 + $0x28] sm:$0xff] }
 0x542   : > { %v1889_v15 = vpop.f32.mrf.mxu2  ;;  %v1902_v16 = vpop.f32.mrf.mxu3 }
 0x544   : > { %v1949_v17 = vpop.f32.mrf.mxu0 }
 0x545   : > { %v2174_v17 = vpack.c.bf16 %v2164_v8, %v2161_v0 }
 0x547   : > { %v1962_v18 = vpop.f32.mrf.mxu1 }
 0x54a   : > { %v1973_v19 = vpop.f32.mrf.mxu2  ;;  %v2020_v20 = vpop.f32.mrf.mxu3 }
 0x54b   : > { %v1979_v42 = vadd.f32 %v1973_v19, %v1906_v36  ;;  %v2050_v46 = vadd.f32 %v2020_v20, %v1977_v43 }
 0x54c   : > { %v2033_v21 = vpop.f32.mrf.mxu0 }
 0x54d   : > { %v2051_v47 = vadd.f32 %v2033_v21, %v1978_v44 }
 0x54f   : > { %v2046_v23 = vpop.f32.mrf.mxu1 }
 0x550   : > { %v2052_v45 = vadd.f32 %v2046_v23, %v1979_v42 }
 0x552   : > { %v1975_v24 = vpop.f32.mrf.mxu2  ;;  %v2022_v26 = vpop.f32.mrf.mxu3 }
 0x554   : > { %v2035_v32 = vpop.f32.mrf.mxu0 }
 0x557   : > { %v2048_v37 = vpop.f32.mrf.mxu1 }
 0x55c   : > { %v2119_v62 = vpop.f32.mrf.mxu0 }
 0x55d   : > { %v2125_v48 = vadd.f32 %v2119_v62, %v2052_v45 }
 0x55e   : > { %v2093_v49 = vpop.f32.mrf.mxu2  ;;  %v2106_v50 = vpop.f32.mrf.mxu3 }
 0x55f   : > { %v2123_v52 = vadd.f32 %v2093_v49, %v2050_v46  ;;  %v2124_v54 = vadd.f32 %v2106_v50, %v2051_v47  ;;  %v2135_v55 = vadd.f32 %v2131_v51, %v2125_v48 }
 0x561   : > { %v2133_v56 = vadd.f32 %v2131_v51, %v2123_v52  ;;  %v2134_v57 = vadd.f32 %v2131_v51, %v2124_v54  ;;  %v2138_v60 = vmax.f32 %v2135_v55, 0.0 }
 0x563   : > { %v2136_v61 = vmax.f32 %v2133_v56, 0.0  ;;  %v2137_v63 = vmax.f32 %v2134_v57, 0.0  ;;  %v2141_v3 = vmul.f32 %v2138_v60, %v2968_v53  ;;  %v2162_v53 = vld [vmem:[#allocation2 + $0x18] sm:$0xff] }
 0x564   : > { %v2121_v6 = vpop.f32.mrf.mxu0  ;;  %v2172_v11 = vpack.c.bf16 %v2162_v53, %v2159_v10 }
 0x565   : > { %v2139_v58 = vmul.f32 %v2136_v61, %v2962_v41  ;;  %v2140_v2 = vmul.f32 %v2137_v63, %v2960_v40  ;;  %2149 = vrot.lane.b32.xlu0 %v2141_v3, %s2691_s26 }
 0x566   : > { %v2095_v1 = vpop.f32.mrf.mxu2  ;;  %v2108_v4 = vpop.f32.mrf.mxu3 }
 0x567   : > { %2145 = vrot.lane.b32.xlu1 %v2139_v58, %s2691_s26  ;;  %2147 = vrot.lane.b32.xlu2 %v2140_v2, %s2691_s26 }
 0x56d   : > { %2192 = vrot.lane.b32.xlu0 %v2173_v9, %s2685_s20 }
 0x575   : > { %2190 = vrot.lane.b32.xlu0 %v2172_v11, %s2685_s20 }
 0x57d   : > { %2260 = vrot.lane.b32.xlu0 %v2160_v5, %s2685_s20 }
 0x5c1   : > { %v2148_v40 = vpop.permute.xlu2 %2147 }
 0x5d7   : > { %v2150_v41 = vpop.permute.xlu0 %2149 }
 0x5d8   : > { %v2152_v12 = vsel %vm288_vm1, %v2148_v40, %v2150_v41 }
 0x5d9   : > { %v2146_v13 = vpop.permute.xlu1 %2145  ;;  %2158 = vst.msk [vmem:[#allocation2 + $0x58] sm:$0xff] %vm917_vm14, %v2152_v12 }
 0x5da   : > { %v2151_v14 = vsel %vm288_vm1, %v2146_v13, %v2148_v40  ;;  %2156 = vst.msk [vmem:[#allocation2 + $0x48] sm:$0xff] %vm914_vm13, %v2146_v13  ;;  %vm2212_vm1 = vcmask 261120  }
 0x5db   : > { %v2176_v59 = vpack.c.bf16 %v2151_v14, %v3104_v29  ;;  %v2178_v29 = vld [vmem:[%s3390_s4] sm:$0xff] }
 0x5dd   : > { %2198 = vrot.lane.b32.xlu1 %v2176_v59, %s2685_s20 }
 0x5e0   : > { %v2170_v15 = vld [vmem:[#allocation2 + $0x58] sm:$0xff] }
 0x5e1   : > { %v2177_v16 = vpack.c.bf16 %v2170_v15, %v3116_v34  ;;  %v2168_v18 = vld [vmem:[#allocation2 + $0x48] sm:$0xff]  ;;  %v2193_v34 = vpop.permute.xlu0 %2192 }
 0x5e2   : > { %v2175_v19 = vpack.c.bf16 %v2168_v18, %v3099_v25 }
 0x5e3   : > { %2200 = vrot.lane.b32.xlu2 %v2177_v16, %s2685_s20 }
 0x5e5   : > { %2194 = vrot.lane.b32.xlu1 %v2174_v17, %s2685_s20 }
 0x5e9   : > { %v2191_v24 = vpop.permute.xlu0 %2190 }
 0x5ea   : > { %v2202_v26 = vsel %vm569_vm8, %v2191_v24, %v2193_v34 }
 0x5eb   : > { %2196 = vrot.lane.b32.xlu2 %v2175_v19, %s2685_s20 }
 0x5ed   : > { %2181 = vperm.xlu1 %2545, %v2178_v29  }
 0x5f1   : > { %v2261_v31 = vpop.permute.xlu0 %2260 }
 0x5f3   : > { %2258 = vrot.lane.b32.xlu2 %v2159_v10, %s2685_s20 }
 0x5f5   : > { %2262 = vrot.lane.b32.xlu1 %v2161_v0, %s2685_s20  ;;  %s2472_s20 = smul.u32 24, %s2751_s28  ;;  %s2277_s28 = scalar_lea.sflag [#allocation5], %s2818_s17 }
 0x5f7   : > { %s2288_s10 = scalar_lea.hbm %s3392_s6, %s2472_s20 }
 0x5f8   : > { %s2292_s13 = sshll.u32 %s2288_s10, 4  ;;  %s2293_s13 = int_to_ptr.hbm [resolvable:$true] %s2292_s13 }
 0x5f9   : > { %s2620_s1 = sshra.s32 %s2293_s13, 4  ;;  %s2621_s1 = int_to_ptr.hbm [resolvable:$true] %s2620_s1 }
 0x5fa   : > { %s2622_s26 = scalar_lea.hbm %s2621_s1, 24  ;;  %p2627_p13 = scmp.lt.s32.totalorder %s2621_s1, %s3392_s6 }
 0x5fb   : > { %p2623_p1 = scmp.ne.s32.totalorder %s2621_s1, %s2622_s26  ;;  %p2628_p8 = scmp.lt.s32.totalorder %s2626_s23, %s2622_s26 }
 0x5fd   : > { %p2624_p3 = pnand %p2623_p1, %p2787_p0  ;;  %p2629_p7 = por %p2628_p8, %p2627_p13 }
 0x5ff   : > { %p2625_p5 = pneg %p2624_p3 }
 0x601   : > { %p2630_p9 = pnand %p2629_p7, %p2625_p5 }
 0x63d   : > { %v2201_v20 = vpop.permute.xlu2 %2200 }
 0x63e   : > { %2248 = vmatpush.bf16.msra.mxu3 %v2201_v20 }
 0x645   : > { %v2197_v21 = vpop.permute.xlu2 %2196 }
 0x64d   : > { %v2259_v33 = vpop.permute.xlu2 %2258 }
 0x64e   : > { %v2265_v36 = vsel %vm569_vm8, %v2259_v33, %v2261_v31 }
 0x64f   : > { %v2199_v22 = vpop.permute.xlu1 %2198 }
 0x650   : > { %v2204_v23 = vsel %vm569_vm8, %v2197_v21, %v2199_v22  ;;  %v2205_v25 = vsel %vm569_vm8, %v2199_v22, %v2201_v20 }
 0x651   : > { %2222 = vmatpush.bf16.msra.mxu1 %v2204_v23  ;;  %2235 = vmatpush.bf16.msra.mxu2 %v2205_v25 }
 0x655   : > { %2223 = vmatpush.bf16.msra.mxu1 %v2202_v26 }
 0x657   : > { %v2195_v28 = vpop.permute.xlu1 %2194 }
 0x658   : > { %2249 = vmatpush.bf16.msra.mxu3 %v2195_v28  ;;  %v2203_v30 = vsel %vm569_vm8, %v2193_v34, %v2195_v28  ;;  %2463 = vmatmul.msk.bf16.vlgmr.msra.gmra.mxu1 %vm2212_vm1, %v2171_v27 }
 0x659   : > { %2236 = vmatpush.bf16.msra.mxu2 %v2203_v30 }
 0x65b   : > { %2465 = vmatmul.msk.bf16.vlgmr.msra.gmra.mxu3 %vm2212_vm1, %v2171_v27 }
 0x65c   : > { %2464 = vmatmul.msk.bf16.vlgmr.msra.gmra.mxu2 %vm2212_vm1, %v2171_v27 }
 0x65f   : > { %v2182_v32 = vpop.permute.xlu1 %2181 }
 0x667   : > { %v2263_v39 = vpop.permute.xlu1 %2262 }
 0x668   : > { %v2266_v46 = vsel %vm569_vm8, %v2261_v31, %v2263_v39 }
 0x6d5   : > { %v2225_v35 = vpop.f32.mrf.mxu1 }
 0x6d6   : > { %v2226_v37 = vadd.f32 %v2225_v35, %v2182_v32 }
 0x6d8   : > { %v2270_v38 = vadd.f32 %v2265_v36, %v2226_v37 }
 0x6da   : > { %2273 = vst [vmem:[%s286_s7] sm:$0xff] %v2270_v38 }
 0x6dd   : > { %v2227_v42 = vpop.f32.mrf.mxu1 }
 0x6de   : > { %v2251_v43 = vpop.f32.mrf.mxu3 }
 0x6df   : > { %v2238_v44 = vpop.f32.mrf.mxu2  ;;  %v2252_v45 = vadd.f32 %v2251_v43, %v2182_v32 }
 0x6e0   : > { %v2239_v47 = vadd.f32 %v2238_v44, %v2182_v32 }
 0x6e1   : > { %v2272_v62 = vadd.f32 %v2263_v39, %v2252_v45 }
 0x6e2   : > { %v2271_v48 = vadd.f32 %v2266_v46, %v2239_v47 }
 0x6e3   : > { %2275 = vst.msk [vmem:[%s286_s7 + $0x10] sm:$0xff] %vm2212_vm1, %v2272_v62 }
 0x6e4   : > { %2274 = vst [vmem:[%s286_s7 + $0x8] sm:$0xff] %v2271_v48 }
 0x6e5   : > { %2633 = shalt.err (!%p2630_p9)
}
 0x6e6   : > { %2479 = dma.vmem_to_hbm [thread:$0]  (%p2787_p0), %s2291_s12, 384, %s2293_s13, %s2277_s28   ;;  %v2253_v49 = vpop.f32.mrf.mxu3 }
 0x6e7   : > { %v2240_v50 = vpop.f32.mrf.mxu2 }
 0x6e8 PF: > { %s2304_s17 = sand.u32 1, %s2664_s21   ;;  %p3403_p10 = scmp.ge.s32.totalorder %s2676_s24, 2 }
 0x6e9   : > { %s2305_s19 = scalar_lea.sflag [#allocation5], %s2304_s17 }
 0x6ea   : > { %p2490_p11 = pnand %p3403_p10, %p2793_p6 }
 0x6ec   : > { %p2491_p12 = pneg %p2490_p11 }
 0x6ee   : > { %2659 = dma.done.wait (%p2491_p12), %s2305_s19, 384  }
 0x6ef   : > { %2661 = vsyncadd (%p2491_p12), %s2305_s19, 4294966912  ;;  %s3404_s27 = sld [smem:[#allocation12_spill]]  ;;  %p20_p0 = scmp.ge.s32.totalorder %s2767_s11, 4  }
 0x6f0   : > { %s3405_s23 = sld [smem:[#allocation13_spill]]  ;;  %s3406_s21 = smov %s2668_s22 }
 0x6f1   : > { %s3408_s24 = smov %s2767_s11  ;;  %22 = sbr.rel (!%p20_p0) target bundleno = 8 (0x8), region = 97 }
 0x6f5   : > { %s3407_s22 = smov %s3404_s27 }
 0x6f6   :  { %2311 = vsyncpa [#allocation4], 1 }
 0x6f7   :  { %2313 = vsyncpa [#allocation4 + $0x1], 1 }
 0x6f8   :  { %2314 = vsyncpa [#allocation7], 1 }
 0x6f9   :  { %2315 = vsyncpa [#allocation5], 1 }
 0x6fa   :  { %2317 = vsyncpa [#allocation5 + $0x1], 1 }

</bundles_post_ra>
